<compile_context>
chip_gen: v5e
topology: v5e:2x2
jax: 0.10.0
libtpu: 0.0.40
codegen_flags: <defaults>
</compile_context>

<pallas_src>
import jax
import jax.numpy as jnp
from jax.experimental import pallas as pl
from jax.experimental.pallas import tpu as pltpu

# -----------------------------------------------------------------------------
# Scaled-down hyperparameters (stand-ins for AlexNet's 9216 / 4096 / 2048 dims)
# -----------------------------------------------------------------------------
B = 2                          # real batch
C_IN, H_IN, W_IN = 3, 16, 16
K = 4                          # conv kernel == stride (non-overlapping patches)
C_F = 8                        # conv output channels
HO, WO = H_IN // K, W_IN // K  # 4, 4
F = C_F * HO * WO              # 128  (stands in for 256*6*6 = 9216)
D = 256                        # fc6 / fc7 width        (stands in for 4096)
DPLUS = 128                    # fc7_plus width         (stands in for 2048)
NUM_CLASSES = [10, 5]          # two classifier heads
NUM_HEADS = len(NUM_CLASSES)
NC_PAD = 128                   # lane-dense padded head-output width
OUT_W = 2 * NC_PAD             # merged output block: [ out | aug ]
K_INIT = 0.5
X_FLAT = C_IN * H_IN * W_IN    # 768
EPS = 1e-12                    # L2-norm clamp (matches F.normalize semantics)


# -----------------------------------------------------------------------------
# Fused Pallas kernel (one batch row-block per grid step; weights VMEM-resident)
# -----------------------------------------------------------------------------
def _fused_kernel(x_ref, wconv_ref, bconv_ref, w6_ref, b6_ref, w7_ref, b7_ref,
                  waugf_ref, waug6_ref, baug_ref, wc7_ref, wcp0_ref, wcp1_ref,
                  bc_ref, out_ref):
    # --- features: stride-K conv + ReLU as one lane-dense (768 -> 128) matmul ---
    xb = x_ref[...].astype(jnp.bfloat16)
    feat = jnp.maximum(
        jnp.dot(xb, wconv_ref[...], preferred_element_type=jnp.float32)
        + bconv_ref[...], 0.0)
    featb = feat.astype(jnp.bfloat16)

    # --- fc6 / fc7 (Dropout = eval-mode identity) ---
    fc6 = jnp.maximum(
        jnp.dot(featb, w6_ref[...], preferred_element_type=jnp.float32)
        + b6_ref[...], 0.0)
    fc6b = fc6.astype(jnp.bfloat16)
    fc7 = jnp.maximum(
        jnp.dot(fc6b, w7_ref[...], preferred_element_type=jnp.float32)
        + b7_ref[...], 0.0)

    # --- merged aug classifiers: fc7_plus of BOTH heads in one pass ---
    # augClassifier_i(cat(features, fc6)) == feat @ Waug_f_i + fc6 @ Waug_6_i + b_i
    fc7p = (jnp.dot(featb, waugf_ref[...], preferred_element_type=jnp.float32)
            + jnp.dot(fc6b, waug6_ref[...], preferred_element_type=jnp.float32)
            + baug_ref[...])

    # --- row-wise L2 normalization (f32, eps-clamped) ---
    norm_fc7 = fc7 * jax.lax.rsqrt(jnp.sum(fc7 * fc7, axis=1, keepdims=True) + EPS)

    # --- merged classifiers: scale folded into weights, heads along lanes.
    # wcp is block-diagonal -> two (128,128) dots, no concatenation of the
    # per-head normalized activations.
    wcp_refs = (wcp0_ref, wcp1_ref)
    aug = bc_ref[...]
    for h in range(NUM_HEADS):                      # static unroll (2 heads)
        p = fc7p[:, h * DPLUS:(h + 1) * DPLUS]      # static 128-aligned slice
        p_n = p * jax.lax.rsqrt(jnp.sum(p * p, axis=1, keepdims=True) + EPS)
        aug = aug + jnp.dot(p_n.astype(jnp.bfloat16), wcp_refs[h][...],
                            preferred_element_type=jnp.float32)

    out = (jnp.dot(norm_fc7.astype(jnp.bfloat16), wc7_ref[...],
                   preferred_element_type=jnp.float32) + aug)

    # Single lane-dense (TB, 256) output block: [ out | aug ]
    out_ref[:, :NC_PAD] = out
    out_ref[:, NC_PAD:] = aug


# -----------------------------------------------------------------------------
# Parameter init (PyTorch-layout) + one-time fusion / folding
# -----------------------------------------------------------------------------
def init_params(key):
    ks = jax.random.split(key, 6 + NUM_HEADS)
    std = 0.05
    p = {}
    # features: Conv2d(C_IN, C_F, K, stride=K) + ReLU
    p["w_conv"] = std * jax.random.normal(ks[0], (C_F, C_IN, K, K), jnp.float32)
    p["b_conv"] = std * jax.random.normal(ks[1], (C_F,), jnp.float32)
    # fc6: Linear(F, D); fc7: Linear(D, D)   (stored as (in, out))
    p["w6"] = std * jax.random.normal(ks[2], (F, D), jnp.float32)
    p["b6"] = std * jax.random.normal(ks[3], (D,), jnp.float32)
    p["w7"] = std * jax.random.normal(ks[4], (D, D), jnp.float32)
    p["b7"] = std * jax.random.normal(ks[5], (D,), jnp.float32)
    p["heads"] = []
    for i in range(NUM_HEADS):
        kk = jax.random.split(ks[6 + i], 4)
        nc = NUM_CLASSES[i]
        # augClassifier_i: Linear(F + D, DPLUS)
        waug = std * jax.random.normal(kk[0], (F + D, DPLUS), jnp.float32)
        baug = std * jax.random.normal(kk[1], (DPLUS,), jnp.float32)
        # classifier_i: Linear(D + DPLUS, nc)
        wc = std * jax.random.normal(kk[2], (D + DPLUS, nc), jnp.float32)
        bc = std * jax.random.normal(kk[3], (nc,), jnp.float32)
        # scale_i: fill(20), first D entries * k_init (guided_learning)
        scale = jnp.full((D + DPLUS,), 20.0, jnp.float32)
        scale = scale.at[:D].multiply(K_INIT)
        p["heads"].append(dict(waug=waug, baug=baug, wc=wc, bc=bc, scale=scale))
    return p


def fuse_params(p):
    """One-time (init-time) parameter transformation for the fused kernel."""
    # Unfold the stride-K conv into a dense (C*H*W, F) matmul whose output
    # columns are already in PyTorch channel-major flatten order.
    w6d = jnp.zeros((C_IN, H_IN, W_IN, C_F, HO, WO), jnp.float32)
    wc_t = p["w_conv"].transpose(1, 2, 3, 0)              # (C_IN, K, K, C_F)
    for ho in range(HO):
        for wo in range(WO):
            w6d = w6d.at[:, ho * K:(ho + 1) * K, wo * K:(wo + 1) * K, :, ho, wo].set(wc_t)
    w_conv_big = w6d.reshape(X_FLAT, F)
    b_conv_big = jnp.repeat(p["b_conv"], HO * WO).reshape(1, F)   # channel-major bias

    # Merge both heads' aug classifiers along the lane axis.
    waug_f = jnp.concatenate([h["waug"][:F] for h in p["heads"]], axis=1)   # (F, 2*DPLUS)
    waug_6 = jnp.concatenate([h["waug"][F:] for h in p["heads"]], axis=1)   # (D, 2*DPLUS)
    baug = jnp.concatenate([h["baug"] for h in p["heads"]]).reshape(1, NUM_HEADS * DPLUS)

    # Merge both heads' classifiers into 128 padded output lanes; fold scale.
    # The fc7_plus part is kept as two separate block-diagonal weights so the
    # kernel can do two 128x128 dots instead of concatenating activations.
    wc7 = jnp.zeros((D, NC_PAD), jnp.float32)
    wcps = [jnp.zeros((DPLUS, NC_PAD), jnp.float32) for _ in range(NUM_HEADS)]
    bc = jnp.zeros((1, NC_PAD), jnp.float32)
    off = 0
    for i, h in enumerate(p["heads"]):
        nc = NUM_CLASSES[i]
        wc7 = wc7.at[:, off:off + nc].set(h["scale"][:D, None] * h["wc"][:D])
        wcps[i] = wcps[i].at[:, off:off + nc].set(h["scale"][D:, None] * h["wc"][D:])
        bc = bc.at[0, off:off + nc].set(h["bc"])
        off += nc

    bf = jnp.bfloat16
    return dict(
        w_conv=w_conv_big.astype(bf), b_conv=b_conv_big,
        w6=p["w6"].astype(bf), b6=p["b6"].reshape(1, D),
        w7=p["w7"].astype(bf), b7=p["b7"].reshape(1, D),
        waug_f=waug_f.astype(bf), waug_6=waug_6.astype(bf), baug=baug,
        wc7=wc7.astype(bf), wcp0=wcps[0].astype(bf), wcp1=wcps[1].astype(bf),
        bc=bc,
    )


# -----------------------------------------------------------------------------
# Forward pass
# -----------------------------------------------------------------------------
def forward(fused, x):
    """x: (B, C_IN, H_IN, W_IN) f32 NCHW. Returns (outputs, augOutputs) lists."""
    b = x.shape[0]
    xf = x.reshape(b, X_FLAT)                       # pure view (row-major), free

    # Batch tile: up to 256 rows per grid step (good MXU row utilization on
    # v6e/v7x, fine on v5e), but no bigger than the (8-padded) batch so tiny
    # demo batches don't pay 16x padding compute.
    tb = 256 if b >= 256 else max(8, ((b + 7) // 8) * 8)
    b_pad = ((b + tb - 1) // tb) * tb
    if b_pad > b:
        xf = jnp.pad(xf, ((0, b_pad - b), (0, 0)))
    n_steps = b_pad // tb

    weight_keys = ["w_conv", "b_conv", "w6", "b6", "w7", "b7",
                   "waug_f", "waug_6", "baug", "wc7", "wcp0", "wcp1", "bc"]
    weights = [fused[k] for k in weight_keys]

    # x / out blocks advance with the grid; every weight block index is
    # constant -> weights are DMA'd once and stay VMEM-resident across steps.
    in_specs = ([pl.BlockSpec((tb, X_FLAT), lambda i: (i, 0))]
                + [pl.BlockSpec(w.shape, lambda i: (0, 0)) for w in weights])
    out_spec = pl.BlockSpec((tb, OUT_W), lambda i: (i, 0))

    flops_per_row = 2 * (X_FLAT * F + F * D + D * D
                         + F * (NUM_HEADS * DPLUS) + D * (NUM_HEADS * DPLUS)
                         + D * NC_PAD + NUM_HEADS * DPLUS * NC_PAD)
    weight_bytes = sum(int(w.size) * w.dtype.itemsize for w in weights)
    cost = pl.CostEstimate(
        flops=flops_per_row * b_pad,
        transcendentals=(1 + NUM_HEADS) * b_pad,
        bytes_accessed=weight_bytes + b_pad * X_FLAT * 4 + b_pad * OUT_W * 4,
    )

    out_all = pl.pallas_call(
        _fused_kernel,
        grid=(n_steps,),
        in_specs=in_specs,
        out_specs=out_spec,
        out_shape=jax.ShapeDtypeStruct((b_pad, OUT_W), jnp.float32),
        compiler_params=pltpu.CompilerParams(
            dimension_semantics=("parallel",)),       # megacore shard on v7x
        cost_estimate=cost,
    )(xf, *weights)

    outputs, aug_outputs = [], []
    off = 0
    for nc in NUM_CLASSES:
        outputs.append(out_all[:b, off:off + nc])
        aug_outputs.append(out_all[:b, NC_PAD + off:NC_PAD + off + nc])
        off += nc
    return outputs, aug_outputs


if __name__ == "__main__":
    key = jax.random.PRNGKey(0)
    k_param, k_x = jax.random.split(key)
    params = init_params(k_param)
    fused = fuse_params(params)
    x = jax.random.normal(k_x, (B, C_IN, H_IN, W_IN), jnp.float32)

    fwd = jax.jit(forward)
    outputs, aug_outputs = fwd(fused, x)
    jax.block_until_ready(outputs)
    jax.block_until_ready(aug_outputs)

    assert len(outputs) == NUM_HEADS and len(aug_outputs) == NUM_HEADS
    for o, a, nc in zip(outputs, aug_outputs, NUM_CLASSES):
        assert o.shape == (B, nc) and a.shape == (B, nc)
        assert bool(jnp.all(jnp.isfinite(o))) and bool(jnp.all(jnp.isfinite(a)))
    print("KERNEL_OK")
</pallas_src>

<mosaic_0001>
module attributes {stable_mosaic.version = 11 : i64} {
  func.func @_fused_kernel(%arg0: i32, %arg1: memref<8x768xf32, #tpu.memory_space<vmem>>, %arg2: memref<768x128xbf16, #tpu.memory_space<vmem>>, %arg3: memref<1x128xf32, #tpu.memory_space<vmem>>, %arg4: memref<128x256xbf16, #tpu.memory_space<vmem>>, %arg5: memref<1x256xf32, #tpu.memory_space<vmem>>, %arg6: memref<256x256xbf16, #tpu.memory_space<vmem>>, %arg7: memref<1x256xf32, #tpu.memory_space<vmem>>, %arg8: memref<128x256xbf16, #tpu.memory_space<vmem>>, %arg9: memref<256x256xbf16, #tpu.memory_space<vmem>>, %arg10: memref<1x256xf32, #tpu.memory_space<vmem>>, %arg11: memref<256x128xbf16, #tpu.memory_space<vmem>>, %arg12: memref<128x128xbf16, #tpu.memory_space<vmem>>, %arg13: memref<128x128xbf16, #tpu.memory_space<vmem>>, %arg14: memref<1x128xf32, #tpu.memory_space<vmem>>, %arg15: memref<8x256xf32, #tpu.memory_space<vmem>>) attributes {dimension_semantics = [#tpu.dimension_semantics<parallel>], iteration_bounds = array<i64: 1>, scalar_prefetch = 0 : i64, scratch_operands = 0 : i64, tpu.core_type = #tpu.core_type<tc>, window_params = [{transform_indices = @transform_0, window_bounds = array<i64: 8, 768>}, {pipeline_mode = #tpu.pipeline_mode<synchronous>, transform_indices = @transform_1, window_bounds = array<i64: 768, 128>}, {pipeline_mode = #tpu.pipeline_mode<synchronous>, transform_indices = @transform_2, window_bounds = array<i64: 1, 128>}, {pipeline_mode = #tpu.pipeline_mode<synchronous>, transform_indices = @transform_3, window_bounds = array<i64: 128, 256>}, {pipeline_mode = #tpu.pipeline_mode<synchronous>, transform_indices = @transform_4, window_bounds = array<i64: 1, 256>}, {pipeline_mode = #tpu.pipeline_mode<synchronous>, transform_indices = @transform_5, window_bounds = array<i64: 256, 256>}, {pipeline_mode = #tpu.pipeline_mode<synchronous>, transform_indices = @transform_6, window_bounds = array<i64: 1, 256>}, {pipeline_mode = #tpu.pipeline_mode<synchronous>, transform_indices = @transform_7, window_bounds = array<i64: 128, 256>}, {pipeline_mode = #tpu.pipeline_mode<synchronous>, transform_indices = @transform_8, window_bounds = array<i64: 256, 256>}, {pipeline_mode = #tpu.pipeline_mode<synchronous>, transform_indices = @transform_9, window_bounds = array<i64: 1, 256>}, {pipeline_mode = #tpu.pipeline_mode<synchronous>, transform_indices = @transform_10, window_bounds = array<i64: 256, 128>}, {pipeline_mode = #tpu.pipeline_mode<synchronous>, transform_indices = @transform_11, window_bounds = array<i64: 128, 128>}, {pipeline_mode = #tpu.pipeline_mode<synchronous>, transform_indices = @transform_12, window_bounds = array<i64: 128, 128>}, {pipeline_mode = #tpu.pipeline_mode<synchronous>, transform_indices = @transform_13, window_bounds = array<i64: 1, 128>}, {transform_indices = @transform_14, window_bounds = array<i64: 8, 256>}]} {
    %c0 = arith.constant 0 : index
    %c0_0 = arith.constant 0 : index
    %0 = vector.load %arg1[%c0, %c0_0] : memref<8x768xf32, #tpu.memory_space<vmem>>, vector<8x768xf32>
    %1 = arith.truncf %0 : vector<8x768xf32> to vector<8x768xbf16>
    %c0_1 = arith.constant 0 : index
    %c0_2 = arith.constant 0 : index
    %2 = vector.load %arg2[%c0_1, %c0_2] : memref<768x128xbf16, #tpu.memory_space<vmem>>, vector<768x128xbf16>
    %cst = arith.constant dense<0.000000e+00> : vector<8x128xf32>
    %3 = tpu.matmul %1, %2, %cst {dimension_numbers = #tpu.dot_dimension_numbers<[1], [0], [0], [1], [0, 0, 1, 1], [], []>} : vector<8x768xbf16>, vector<768x128xbf16>, vector<8x128xf32> -> vector<8x128xf32>
    %c0_3 = arith.constant 0 : index
    %c0_4 = arith.constant 0 : index
    %4 = vector.load %arg3[%c0_3, %c0_4] : memref<1x128xf32, #tpu.memory_space<vmem>>, vector<1x128xf32>
    %5 = vector.broadcast %4 : vector<1x128xf32> to vector<8x128xf32>
    %6 = arith.addf %3, %5 : vector<8x128xf32>
    %cst_5 = arith.constant 0.000000e+00 : f32
    %7 = vector.broadcast %cst_5 : f32 to vector<8x128xf32>
    %8 = arith.maximumf %6, %7 : vector<8x128xf32>
    %9 = arith.truncf %8 : vector<8x128xf32> to vector<8x128xbf16>
    %c0_6 = arith.constant 0 : index
    %c0_7 = arith.constant 0 : index
    %10 = vector.load %arg4[%c0_6, %c0_7] : memref<128x256xbf16, #tpu.memory_space<vmem>>, vector<128x256xbf16>
    %cst_8 = arith.constant dense<0.000000e+00> : vector<8x256xf32>
    %11 = tpu.matmul %9, %10, %cst_8 {dimension_numbers = #tpu.dot_dimension_numbers<[1], [0], [0], [1], [0, 0, 1, 1], [], []>} : vector<8x128xbf16>, vector<128x256xbf16>, vector<8x256xf32> -> vector<8x256xf32>
    %c0_9 = arith.constant 0 : index
    %c0_10 = arith.constant 0 : index
    %12 = vector.load %arg5[%c0_9, %c0_10] : memref<1x256xf32, #tpu.memory_space<vmem>>, vector<1x256xf32>
    %13 = vector.broadcast %12 : vector<1x256xf32> to vector<8x256xf32>
    %14 = arith.addf %11, %13 : vector<8x256xf32>
    %cst_11 = arith.constant 0.000000e+00 : f32
    %15 = vector.broadcast %cst_11 : f32 to vector<8x256xf32>
    %16 = arith.maximumf %14, %15 : vector<8x256xf32>
    %17 = arith.truncf %16 : vector<8x256xf32> to vector<8x256xbf16>
    %c0_12 = arith.constant 0 : index
    %c0_13 = arith.constant 0 : index
    %18 = vector.load %arg6[%c0_12, %c0_13] : memref<256x256xbf16, #tpu.memory_space<vmem>>, vector<256x256xbf16>
    %cst_14 = arith.constant dense<0.000000e+00> : vector<8x256xf32>
    %19 = tpu.matmul %17, %18, %cst_14 {dimension_numbers = #tpu.dot_dimension_numbers<[1], [0], [0], [1], [0, 0, 1, 1], [], []>} : vector<8x256xbf16>, vector<256x256xbf16>, vector<8x256xf32> -> vector<8x256xf32>
    %c0_15 = arith.constant 0 : index
    %c0_16 = arith.constant 0 : index
    %20 = vector.load %arg7[%c0_15, %c0_16] : memref<1x256xf32, #tpu.memory_space<vmem>>, vector<1x256xf32>
    %21 = vector.broadcast %20 : vector<1x256xf32> to vector<8x256xf32>
    %22 = arith.addf %19, %21 : vector<8x256xf32>
    %cst_17 = arith.constant 0.000000e+00 : f32
    %23 = vector.broadcast %cst_17 : f32 to vector<8x256xf32>
    %24 = arith.maximumf %22, %23 : vector<8x256xf32>
    %c0_18 = arith.constant 0 : index
    %c0_19 = arith.constant 0 : index
    %25 = vector.load %arg8[%c0_18, %c0_19] : memref<128x256xbf16, #tpu.memory_space<vmem>>, vector<128x256xbf16>
    %cst_20 = arith.constant dense<0.000000e+00> : vector<8x256xf32>
    %26 = tpu.matmul %9, %25, %cst_20 {dimension_numbers = #tpu.dot_dimension_numbers<[1], [0], [0], [1], [0, 0, 1, 1], [], []>} : vector<8x128xbf16>, vector<128x256xbf16>, vector<8x256xf32> -> vector<8x256xf32>
    %c0_21 = arith.constant 0 : index
    %c0_22 = arith.constant 0 : index
    %27 = vector.load %arg9[%c0_21, %c0_22] : memref<256x256xbf16, #tpu.memory_space<vmem>>, vector<256x256xbf16>
    %cst_23 = arith.constant dense<0.000000e+00> : vector<8x256xf32>
    %28 = tpu.matmul %17, %27, %cst_23 {dimension_numbers = #tpu.dot_dimension_numbers<[1], [0], [0], [1], [0, 0, 1, 1], [], []>} : vector<8x256xbf16>, vector<256x256xbf16>, vector<8x256xf32> -> vector<8x256xf32>
    %29 = arith.addf %26, %28 : vector<8x256xf32>
    %c0_24 = arith.constant 0 : index
    %c0_25 = arith.constant 0 : index
    %30 = vector.load %arg10[%c0_24, %c0_25] : memref<1x256xf32, #tpu.memory_space<vmem>>, vector<1x256xf32>
    %31 = vector.broadcast %30 : vector<1x256xf32> to vector<8x256xf32>
    %32 = arith.addf %29, %31 : vector<8x256xf32>
    %33 = arith.mulf %24, %24 : vector<8x256xf32>
    %cst_26 = arith.constant dense<0.000000e+00> : vector<8xf32>
    %34 = vector.multi_reduction <add>, %33, %cst_26 [1] : vector<8x256xf32> to vector<8xf32>
    %35 = vector.shape_cast %34 : vector<8xf32> to vector<8x1xf32>
    %cst_27 = arith.constant 9.99999996E-13 : f32
    %36 = vector.broadcast %cst_27 : f32 to vector<8x1xf32>
    %37 = arith.addf %35, %36 : vector<8x1xf32>
    %38 = math.rsqrt %37 : vector<8x1xf32>
    %39 = vector.broadcast %38 : vector<8x1xf32> to vector<8x256xf32>
    %40 = arith.mulf %24, %39 : vector<8x256xf32>
    %c0_28 = arith.constant 0 : index
    %c0_29 = arith.constant 0 : index
    %41 = vector.load %arg14[%c0_28, %c0_29] : memref<1x128xf32, #tpu.memory_space<vmem>>, vector<1x128xf32>
    %42 = vector.extract_strided_slice %32 {offsets = [0, 0], sizes = [8, 128], strides = [1, 1]} : vector<8x256xf32> to vector<8x128xf32>
    %43 = arith.mulf %42, %42 : vector<8x128xf32>
    %cst_30 = arith.constant dense<0.000000e+00> : vector<8xf32>
    %44 = vector.multi_reduction <add>, %43, %cst_30 [1] : vector<8x128xf32> to vector<8xf32>
    %45 = vector.shape_cast %44 : vector<8xf32> to vector<8x1xf32>
    %cst_31 = arith.constant 9.99999996E-13 : f32
    %46 = vector.broadcast %cst_31 : f32 to vector<8x1xf32>
    %47 = arith.addf %45, %46 : vector<8x1xf32>
    %48 = math.rsqrt %47 : vector<8x1xf32>
    %49 = vector.broadcast %48 : vector<8x1xf32> to vector<8x128xf32>
    %50 = arith.mulf %42, %49 : vector<8x128xf32>
    %51 = arith.truncf %50 : vector<8x128xf32> to vector<8x128xbf16>
    %c0_32 = arith.constant 0 : index
    %c0_33 = arith.constant 0 : index
    %52 = vector.load %arg12[%c0_32, %c0_33] : memref<128x128xbf16, #tpu.memory_space<vmem>>, vector<128x128xbf16>
    %cst_34 = arith.constant dense<0.000000e+00> : vector<8x128xf32>
    %53 = tpu.matmul %51, %52, %cst_34 {dimension_numbers = #tpu.dot_dimension_numbers<[1], [0], [0], [1], [0, 0, 1, 1], [], []>} : vector<8x128xbf16>, vector<128x128xbf16>, vector<8x128xf32> -> vector<8x128xf32>
    %54 = vector.broadcast %41 : vector<1x128xf32> to vector<8x128xf32>
    %55 = arith.addf %54, %53 : vector<8x128xf32>
    %56 = vector.extract_strided_slice %32 {offsets = [0, 128], sizes = [8, 128], strides = [1, 1]} : vector<8x256xf32> to vector<8x128xf32>
    %57 = arith.mulf %56, %56 : vector<8x128xf32>
    %cst_35 = arith.constant dense<0.000000e+00> : vector<8xf32>
    %58 = vector.multi_reduction <add>, %57, %cst_35 [1] : vector<8x128xf32> to vector<8xf32>
    %59 = vector.shape_cast %58 : vector<8xf32> to vector<8x1xf32>
    %cst_36 = arith.constant 9.99999996E-13 : f32
    %60 = vector.broadcast %cst_36 : f32 to vector<8x1xf32>
    %61 = arith.addf %59, %60 : vector<8x1xf32>
    %62 = math.rsqrt %61 : vector<8x1xf32>
    %63 = vector.broadcast %62 : vector<8x1xf32> to vector<8x128xf32>
    %64 = arith.mulf %56, %63 : vector<8x128xf32>
    %65 = arith.truncf %64 : vector<8x128xf32> to vector<8x128xbf16>
    %c0_37 = arith.constant 0 : index
    %c0_38 = arith.constant 0 : index
    %66 = vector.load %arg13[%c0_37, %c0_38] : memref<128x128xbf16, #tpu.memory_space<vmem>>, vector<128x128xbf16>
    %cst_39 = arith.constant dense<0.000000e+00> : vector<8x128xf32>
    %67 = tpu.matmul %65, %66, %cst_39 {dimension_numbers = #tpu.dot_dimension_numbers<[1], [0], [0], [1], [0, 0, 1, 1], [], []>} : vector<8x128xbf16>, vector<128x128xbf16>, vector<8x128xf32> -> vector<8x128xf32>
    %68 = arith.addf %55, %67 : vector<8x128xf32>
    %69 = arith.truncf %40 : vector<8x256xf32> to vector<8x256xbf16>
    %c0_40 = arith.constant 0 : index
    %c0_41 = arith.constant 0 : index
    %70 = vector.load %arg11[%c0_40, %c0_41] : memref<256x128xbf16, #tpu.memory_space<vmem>>, vector<256x128xbf16>
    %cst_42 = arith.constant dense<0.000000e+00> : vector<8x128xf32>
    %71 = tpu.matmul %69, %70, %cst_42 {dimension_numbers = #tpu.dot_dimension_numbers<[1], [0], [0], [1], [0, 0, 1, 1], [], []>} : vector<8x256xbf16>, vector<256x128xbf16>, vector<8x128xf32> -> vector<8x128xf32>
    %72 = arith.addf %71, %68 : vector<8x128xf32>
    %c0_43 = arith.constant 0 : index
    %c0_44 = arith.constant 0 : index
    %73 = vector.load %arg15[%c0_43, %c0_44] : memref<8x256xf32, #tpu.memory_space<vmem>>, vector<8x128xf32>
    tpu.vector_store %arg15[%c0_43, %c0_44], %72 {strides = array<i32>} : memref<8x256xf32, #tpu.memory_space<vmem>>, vector<8x128xf32>,
    %c0_45 = arith.constant 0 : index
    %c128 = arith.constant 128 : index
    %74 = vector.load %arg15[%c0_45, %c128] : memref<8x256xf32, #tpu.memory_space<vmem>>, vector<8x128xf32>
    tpu.vector_store %arg15[%c0_45, %c128], %68 {strides = array<i32>} : memref<8x256xf32, #tpu.memory_space<vmem>>, vector<8x128xf32>,
    return
  }
  func.func @transform_0(%arg0: i32) -> (i32, i32) {
    %c0_i32 = arith.constant 0 : i32
    %c0_i32_0 = arith.constant 0 : i32
    return %arg0, %c0_i32 : i32, i32
  }
  func.func @transform_1(%arg0: i32) -> (i32, i32) {
    %c0_i32 = arith.constant 0 : i32
    %c0_i32_0 = arith.constant 0 : i32
    %c0_i32_1 = arith.constant 0 : i32
    return %c0_i32, %c0_i32_0 : i32, i32
  }
  func.func @transform_2(%arg0: i32) -> (i32, i32) {
    %c0_i32 = arith.constant 0 : i32
    %c0_i32_0 = arith.constant 0 : i32
    %c0_i32_1 = arith.constant 0 : i32
    return %c0_i32, %c0_i32_0 : i32, i32
  }
  func.func @transform_3(%arg0: i32) -> (i32, i32) {
    %c0_i32 = arith.constant 0 : i32
    %c0_i32_0 = arith.constant 0 : i32
    %c0_i32_1 = arith.constant 0 : i32
    return %c0_i32, %c0_i32_0 : i32, i32
  }
  func.func @transform_4(%arg0: i32) -> (i32, i32) {
    %c0_i32 = arith.constant 0 : i32
    %c0_i32_0 = arith.constant 0 : i32
    %c0_i32_1 = arith.constant 0 : i32
    return %c0_i32, %c0_i32_0 : i32, i32
  }
  func.func @transform_5(%arg0: i32) -> (i32, i32) {
    %c0_i32 = arith.constant 0 : i32
    %c0_i32_0 = arith.constant 0 : i32
    %c0_i32_1 = arith.constant 0 : i32
    return %c0_i32, %c0_i32_0 : i32, i32
  }
  func.func @transform_6(%arg0: i32) -> (i32, i32) {
    %c0_i32 = arith.constant 0 : i32
    %c0_i32_0 = arith.constant 0 : i32
    %c0_i32_1 = arith.constant 0 : i32
    return %c0_i32, %c0_i32_0 : i32, i32
  }
  func.func @transform_7(%arg0: i32) -> (i32, i32) {
    %c0_i32 = arith.constant 0 : i32
    %c0_i32_0 = arith.constant 0 : i32
    %c0_i32_1 = arith.constant 0 : i32
    return %c0_i32, %c0_i32_0 : i32, i32
  }
  func.func @transform_8(%arg0: i32) -> (i32, i32) {
    %c0_i32 = arith.constant 0 : i32
    %c0_i32_0 = arith.constant 0 : i32
    %c0_i32_1 = arith.constant 0 : i32
    return %c0_i32, %c0_i32_0 : i32, i32
  }
  func.func @transform_9(%arg0: i32) -> (i32, i32) {
    %c0_i32 = arith.constant 0 : i32
    %c0_i32_0 = arith.constant 0 : i32
    %c0_i32_1 = arith.constant 0 : i32
    return %c0_i32, %c0_i32_0 : i32, i32
  }
  func.func @transform_10(%arg0: i32) -> (i32, i32) {
    %c0_i32 = arith.constant 0 : i32
    %c0_i32_0 = arith.constant 0 : i32
    %c0_i32_1 = arith.constant 0 : i32
    return %c0_i32, %c0_i32_0 : i32, i32
  }
  func.func @transform_11(%arg0: i32) -> (i32, i32) {
    %c0_i32 = arith.constant 0 : i32
    %c0_i32_0 = arith.constant 0 : i32
    %c0_i32_1 = arith.constant 0 : i32
    return %c0_i32, %c0_i32_0 : i32, i32
  }
  func.func @transform_12(%arg0: i32) -> (i32, i32) {
    %c0_i32 = arith.constant 0 : i32
    %c0_i32_0 = arith.constant 0 : i32
    %c0_i32_1 = arith.constant 0 : i32
    return %c0_i32, %c0_i32_0 : i32, i32
  }
  func.func @transform_13(%arg0: i32) -> (i32, i32) {
    %c0_i32 = arith.constant 0 : i32
    %c0_i32_0 = arith.constant 0 : i32
    %c0_i32_1 = arith.constant 0 : i32
    return %c0_i32, %c0_i32_0 : i32, i32
  }
  func.func @transform_14(%arg0: i32) -> (i32, i32) {
    %c0_i32 = arith.constant 0 : i32
    %c0_i32_0 = arith.constant 0 : i32
    return %arg0, %c0_i32 : i32, i32
  }
}

</mosaic_0001>

<bundles_post_ra>
// kernel: forward.1
= control target key start
LH: loop header
LB: loop body
LE: loop exit
PB: predicated region body
PF: predicated region fallthrough
CT: control target
= control target key end

     0   :  { %19 = vsyncpa [#allocation3], 0  ;;  %s3131_s0 = inlined_call_operand.vmem [shape: f32[8,768], index: 0, kind: input, shape index: {}]   ;;  %s3132_s1 = inlined_call_operand.hbm [shape: bf16[768,128], index: 1, kind: input, shape index: {}]   ;;  %s3133_s2 = inlined_call_operand.vmem [shape: f32[1,128], index: 2, kind: input, shape index: {}]   ;;  %s3134_s3 = inlined_call_operand.vmem [shape: bf16[128,256], index: 3, kind: input, shape index: {}]   ;;  %s3135_s4 = inlined_call_operand.vmem [shape: f32[1,256], index: 4, kind: input, shape index: {}]   ;;  %s3136_s5 = inlined_call_operand.hbm [shape: bf16[256,256], index: 5, kind: input, shape index: {}]   ;;  %s3137_s6 = inlined_call_operand.vmem [shape: f32[1,256], index: 6, kind: input, shape index: {}]   ;;  %s3138_s7 = inlined_call_operand.hbm [shape: bf16[128,256], index: 7, kind: input, shape index: {}]   ;;  %s3139_s8 = inlined_call_operand.hbm [shape: bf16[256,256], index: 8, kind: input, shape index: {}]   ;;  %s3140_s9 = inlined_call_operand.vmem [shape: f32[1,256], index: 9, kind: input, shape index: {}]   ;;  %s3141_s10 = inlined_call_operand.hbm [shape: bf16[256,128], index: 10, kind: input, shape index: {}]   ;;  %s3142_s11 = inlined_call_operand.hbm [shape: bf16[128,128], index: 11, kind: input, shape index: {}]   ;;  %s3143_s12 = inlined_call_operand.hbm [shape: bf16[128,128], index: 12, kind: input, shape index: {}]   ;;  %s3144_s13 = inlined_call_operand.vmem [shape: f32[1,128], index: 13, kind: input, shape index: {}]   ;;  %s3145_s14 = inlined_call_operand.vmem [shape: f32[8,256], index: 14, kind: output, shape index: {}]  }
   0x1   :  { %20 = vsyncpa [#allocation5], 0 }
   0x2   :  { %21 = vsyncpa [#allocation8], 0  ;;  %s48_s15 = sshll.u32 %s3136_s5, 4  ;;  %s49_s15 = int_to_ptr.hbm [resolvable:$true] %s48_s15 }
   0x3   :  { %22 = vsyncpa [#allocation11], 0  ;;  %s2845_s16 = smov [#allocation4]   ;;  %s76_s20 = sshll.u32 %s3139_s8, 4  ;;  %s77_s20 = int_to_ptr.hbm [resolvable:$true] %s76_s20 }
   0x4   :  { %s50_s17 = sshll.u32 %s2845_s16, 4  ;;  %s2846_s21 = smov 128   ;;  %s51_s17 = int_to_ptr.vmem [resolvable:$true] %s50_s17 }
   0x5   :  { %s2847_s22 = smov 8   ;;  %s2848_s23 = smov [#allocation7]  }
   0x6   :  { %56 = dma.hbm_to_vmem [thread:$0]  %s49_s15, 4096, %s51_s17, [#allocation5], %s2846_s21, %s2846_s21, %s2847_s22  }
   0x7   :  { %s78_s24 = sshll.u32 %s2848_s23, 4  ;;  %s104_s26 = sshll.u32 %s3142_s11, 4  ;;  %s79_s24 = int_to_ptr.vmem [resolvable:$true] %s78_s24  ;;  %s105_s26 = int_to_ptr.hbm [resolvable:$true] %s104_s26 }
   0x8   :  { %84 = dma.hbm_to_vmem [thread:$0]  %s77_s20, 4096, %s79_s24, [#allocation8], %s2846_s21, %s2846_s21, %s2847_s22  }
   0x9   :  { %s2849_s8 = smov [#allocation10]   ;;  %s29_s30 = sshll.u32 %s3132_s1, 4  ;;  %s30_s30 = int_to_ptr.hbm [resolvable:$true] %s29_s30 }
   0xa   :  { %s106_s27 = sshll.u32 %s2849_s8, 4  ;;  %s2850_s15 = smov 64   ;;  %s107_s27 = int_to_ptr.vmem [resolvable:$true] %s106_s27 }
   0xb   :  { %s2851_s16 = smov 4   ;;  %s2852_s17 = smov [#allocation2]  }
   0xc   :  { %112 = dma.hbm_to_vmem [thread:$0]  %s105_s26, 1024, %s107_s27, [#allocation11], %s2850_s15, %s2850_s15, %s2851_s16  }
   0xd   :  { %s31_s18 = sshll.u32 %s2852_s17, 4  ;;  %s63_s23 = sshll.u32 %s3138_s7, 4  ;;  %s32_s18 = int_to_ptr.vmem [resolvable:$true] %s31_s18  ;;  %s64_s23 = int_to_ptr.hbm [resolvable:$true] %s63_s23 }
   0xe   :  { %37 = dma.hbm_to_vmem [thread:$0]  %s30_s30, 6144, %s32_s18, [#allocation3], %s2850_s15, %s2850_s15, %s2851_s16  }
   0xf   :  { %s91_s5 = sshll.u32 %s3141_s10, 4  ;;  %s2853_s25 = smov [#allocation6]   ;;  %s92_s5 = int_to_ptr.hbm [resolvable:$true] %s91_s5 }
  0x10   :  { %s65_s8 = sshll.u32 %s2853_s25, 4  ;;  %s2854_s1 = smov [#allocation9]   ;;  %s66_s8 = int_to_ptr.vmem [resolvable:$true] %s65_s8 }
  0x11   :  { %71 = dma.hbm_to_vmem [thread:$0]  %s64_s23, 2048, %s66_s8, [#allocation5], %s2846_s21, %s2846_s21, %s2847_s22  }
  0x12   :  { %s93_s26 = sshll.u32 %s2854_s1, 4  ;;  %s117_s7 = sshll.u32 %s3143_s12, 4  ;;  %s94_s26 = int_to_ptr.vmem [resolvable:$true] %s93_s26  ;;  %s118_s7 = int_to_ptr.hbm [resolvable:$true] %s117_s7 }
  0x13   :  { %99 = dma.hbm_to_vmem [thread:$0]  %s92_s5, 2048, %s94_s26, [#allocation8], %s2850_s15, %s2850_s15, %s2851_s16  }
  0x14   :  { %s2855_s29 = smov [#allocation12]  }
  0x15   :  { %s119_s30 = sshll.u32 %s2855_s29, 4  ;;  %s120_s30 = int_to_ptr.vmem [resolvable:$true] %s119_s30 }
  0x16   :  { %125 = dma.hbm_to_vmem [thread:$0]  %s118_s7, 1024, %s120_s30, [#allocation11], %s2850_s15, %s2850_s15, %s2851_s16  }
  0x17   :  { %2837 = dma.done.wait [#allocation3], 6144  }
  0x18   :  { %2838 = vsyncadd [#allocation3], 4294961152 }
  0x19   :  { %2839 = dma.done.wait [#allocation5], 6144  }
  0x1a   :  { %2840 = vsyncadd [#allocation5], 4294961152 }
  0x1b   :  { %2841 = dma.done.wait [#allocation8], 6144  }
  0x1c   :  { %2842 = vsyncadd [#allocation8], 4294961152 }
  0x1d   :  { %2843 = dma.done.wait [#allocation11], 2048  }
  0x1e   :  { %2844 = vsyncadd [#allocation11], 4294965248  ;;  %v2481_v0 = vld [vmem:[#allocation2 + $0x38] sm:$0xff]  ;;  %v2480_v2 = vld [vmem:[#allocation2 + $0x30] sm:$0xff] }
  0x1f   :  { %v2489_v1 = vld [vmem:[#allocation2 + $0x78] sm:$0xff]  ;;  %556 = vmatpush.bf16.msra.mxu0 %v2481_v0  ;;  %v2488_v3 = vld [vmem:[#allocation2 + $0x70] sm:$0xff]  ;;  %v2479_v8 = vld [vmem:[#allocation2 + $0x28] sm:$0xff] }
  0x20   :  { %569 = vmatpush.bf16.msra.mxu1 %v2489_v1  ;;  %v2497_v4 = vld [vmem:[#allocation2 + $0xb8] sm:$0xff]  ;;  %v2496_v6 = vld [vmem:[#allocation2 + $0xb0] sm:$0xff]  ;;  %v2487_v9 = vld [vmem:[#allocation2 + $0x68] sm:$0xff] }
  0x21   :  { %v2505_v5 = vld [vmem:[#allocation2 + $0xf8] sm:$0xff]  ;;  %582 = vmatpush.bf16.msra.mxu2 %v2497_v4  ;;  %v2504_v7 = vld [vmem:[#allocation2 + $0xf0] sm:$0xff]  ;;  %v2495_v10 = vld [vmem:[#allocation2 + $0xa8] sm:$0xff] }
  0x22   :  { %595 = vmatpush.bf16.msra.mxu3 %v2505_v5  ;;  %v2503_v11 = vld [vmem:[#allocation2 + $0xe8] sm:$0xff]  ;;  %v2478_v12 = vld [vmem:[#allocation2 + $0x20] sm:$0xff]  ;;  %v2477_v16 = vld [vmem:[#allocation2 + $0x18] sm:$0xff] }
  0x23   :  { %557 = vmatpush.bf16.msra.mxu0 %v2480_v2  ;;  %v2486_v13 = vld [vmem:[#allocation2 + $0x60] sm:$0xff]  ;;  %v2485_v17 = vld [vmem:[#allocation2 + $0x58] sm:$0xff]  ;;  %v2476_v20 = vld [vmem:[#allocation2 + $0x10] sm:$0xff] }
  0x24   :  { %570 = vmatpush.bf16.msra.mxu1 %v2488_v3  ;;  %v2494_v14 = vld [vmem:[#allocation2 + $0xa0] sm:$0xff]  ;;  %v2493_v18 = vld [vmem:[#allocation2 + $0x98] sm:$0xff]  ;;  %v2484_v21 = vld [vmem:[#allocation2 + $0x50] sm:$0xff] }
  0x25   :  { %583 = vmatpush.bf16.msra.mxu2 %v2496_v6  ;;  %v2502_v15 = vld [vmem:[#allocation2 + $0xe0] sm:$0xff]  ;;  %v2501_v19 = vld [vmem:[#allocation2 + $0xd8] sm:$0xff]  ;;  %v2492_v22 = vld [vmem:[#allocation2 + $0x90] sm:$0xff] }
  0x26   :  { %596 = vmatpush.bf16.msra.mxu3 %v2504_v7  ;;  %v2500_v23 = vld [vmem:[#allocation2 + $0xd0] sm:$0xff]  ;;  %v2475_v24 = vld [vmem:[#allocation2 + $0x8] sm:$0xff]  ;;  %v2474_v27 = vld [vmem:[#allocation2] sm:$0xff] }
  0x27   :  { %558 = vmatpush.bf16.msra.mxu0 %v2479_v8  ;;  %v2483_v25 = vld [vmem:[#allocation2 + $0x48] sm:$0xff]  ;;  %v2482_v29 = vld [vmem:[#allocation2 + $0x40] sm:$0xff]  ;;  %v2513_v32 = vld [vmem:[#allocation2 + $0x138] sm:$0xff] }
  0x28   :  { %571 = vmatpush.bf16.msra.mxu1 %v2487_v9  ;;  %v2491_v26 = vld [vmem:[#allocation2 + $0x88] sm:$0xff]  ;;  %v156_v30 = vld [vmem:[%s3131_s0] sm:$0xff]  ;;  %v2521_v33 = vld [vmem:[#allocation2 + $0x178] sm:$0xff] }
  0x29   :  { %584 = vmatpush.bf16.msra.mxu2 %v2495_v10  ;;  %v2499_v28 = vld [vmem:[#allocation2 + $0xc8] sm:$0xff]  ;;  %v2490_v34 = vld [vmem:[#allocation2 + $0x80] sm:$0xff]  ;;  %v162_v35 = vpack.c.bf16 %v156_v30, %v156_v30  ;;  %v158_v37 = vld [vmem:[%s3131_s0 + $0x10] sm:$0xff] }
  0x2a   :  { %597 = vmatpush.bf16.msra.mxu3 %v2503_v11  ;;  %v157_v31 = vld [vmem:[%s3131_s0 + $0x8] sm:$0xff]  ;;  %v2498_v38 = vld [vmem:[#allocation2 + $0xc0] sm:$0xff]  ;;  %v159_v39 = vld [vmem:[%s3131_s0 + $0x18] sm:$0xff]  ;;  %v164_v42 = vpack.c.bf16 %v158_v37, %v158_v37 }
  0x2b   :  { %559 = vmatpush.bf16.msra.mxu0 %v2478_v12  ;;  %v163_v36 = vpack.c.bf16 %v157_v31, %v157_v31  ;;  %v2512_v40 = vld [vmem:[#allocation2 + $0x130] sm:$0xff]  ;;  %v165_v43 = vpack.c.bf16 %v159_v39, %v159_v39  ;;  %v2511_v44 = vld [vmem:[#allocation2 + $0x128] sm:$0xff]  ;;  %v2510_v46 = vld [vmem:[#allocation2 + $0x120] sm:$0xff] }
  0x2c   :  { %572 = vmatpush.bf16.msra.mxu1 %v2486_v13  ;;  %v2520_v41 = vld [vmem:[#allocation2 + $0x170] sm:$0xff]  ;;  %v2519_v45 = vld [vmem:[#allocation2 + $0x168] sm:$0xff]  ;;  %v2518_v47 = vld [vmem:[#allocation2 + $0x160] sm:$0xff] }
  0x2d   :  { %585 = vmatpush.bf16.msra.mxu2 %v2494_v14  ;;  %v2509_v48 = vld [vmem:[#allocation2 + $0x118] sm:$0xff]  ;;  %v2508_v50 = vld [vmem:[#allocation2 + $0x110] sm:$0xff]  ;;  %v2507_v52 = vld [vmem:[#allocation2 + $0x108] sm:$0xff] }
  0x2e   :  { %598 = vmatpush.bf16.msra.mxu3 %v2502_v15  ;;  %v2517_v49 = vld [vmem:[#allocation2 + $0x158] sm:$0xff]  ;;  %v2516_v51 = vld [vmem:[#allocation2 + $0x150] sm:$0xff]  ;;  %v2515_v53 = vld [vmem:[#allocation2 + $0x148] sm:$0xff] }
  0x2f   :  { %560 = vmatpush.bf16.msra.mxu0 %v2477_v16  ;;  %v2506_v54 = vld [vmem:[#allocation2 + $0x100] sm:$0xff]  ;;  %v161_v57 = vld [vmem:[%s3131_s0 + $0x28] sm:$0xff]  ;;  %v2020_v60 = vld [vmem:[%s3134_s3 + $0x70] sm:$0xf] }
  0x30   :  { %573 = vmatpush.bf16.msra.mxu1 %v2485_v17  ;;  %v2514_v55 = vld [vmem:[#allocation2 + $0x140] sm:$0xff]  ;;  %v167_v59 = vpack.c.bf16 %v161_v57, %v161_v57  ;;  %v2537_v61 = vld [vmem:[%s3134_s3 + $0x74] sm:$0xf0]  ;;  %v2536_v62 = vld [vmem:[%s3134_s3 + $0x74] sm:$0xf] }
  0x31   :  { %586 = vmatpush.bf16.msra.mxu2 %v2493_v18  ;;  %v160_v56 = vld [vmem:[%s3131_s0 + $0x20] sm:$0xff]  ;;  %v2021_v63 = vor.u32 %v2537_v61, %v2020_v60  ;;  %v2022_v0 = vld [vmem:[%s3134_s3 + $0x78] sm:$0xf0]  ;;  %v2535_v2 = vld [vmem:[%s3134_s3 + $0x64] sm:$0xf0] }
  0x32   :  { %599 = vmatpush.bf16.msra.mxu3 %v2501_v19  ;;  %v166_v58 = vpack.c.bf16 %v160_v56, %v160_v56  ;;  %v2012_v1 = vld [vmem:[%s3134_s3 + $0x60] sm:$0xf]  ;;  %v2025_v3 = vor.u32 %v2536_v62, %v2022_v0  ;;  %v2534_v4 = vld [vmem:[%s3134_s3 + $0x64] sm:$0xf]  ;;  %v2014_v5 = vld [vmem:[%s3134_s3 + $0x68] sm:$0xf0] }
  0x33   :  { %561 = vmatpush.bf16.msra.mxu0 %v2476_v20  ;;  %v2013_v6 = vor.u32 %v2535_v2, %v2012_v1  ;;  %v2017_v7 = vor.u32 %v2534_v4, %v2014_v5  ;;  %v2004_v8 = vld [vmem:[%s3134_s3 + $0x50] sm:$0xf]  ;;  %v2533_v9 = vld [vmem:[%s3134_s3 + $0x54] sm:$0xf0]  ;;  %v2532_v10 = vld [vmem:[%s3134_s3 + $0x54] sm:$0xf] }
  0x34   :  { %574 = vmatpush.bf16.msra.mxu1 %v2484_v21  ;;  %v2006_v11 = vld [vmem:[%s3134_s3 + $0x58] sm:$0xf0]  ;;  %v2005_v12 = vor.u32 %v2533_v9, %v2004_v8  ;;  %v1996_v14 = vld [vmem:[%s3134_s3 + $0x40] sm:$0xf]  ;;  %v2531_v15 = vld [vmem:[%s3134_s3 + $0x44] sm:$0xf0] }
  0x35   :  { %587 = vmatpush.bf16.msra.mxu2 %v2492_v22  ;;  %v2009_v13 = vor.u32 %v2532_v10, %v2006_v11  ;;  %v2530_v16 = vld [vmem:[%s3134_s3 + $0x44] sm:$0xf]  ;;  %v1998_v17 = vld [vmem:[%s3134_s3 + $0x48] sm:$0xf0]  ;;  %v1997_v18 = vor.u32 %v2531_v15, %v1996_v14  ;;  %v1988_v20 = vld [vmem:[%s3134_s3 + $0x30] sm:$0xf] }
  0x36   :  { %600 = vmatpush.bf16.msra.mxu3 %v2500_v23  ;;  %v2001_v19 = vor.u32 %v2530_v16, %v1998_v17  ;;  %v2529_v21 = vld [vmem:[%s3134_s3 + $0x34] sm:$0xf0]  ;;  %v2528_v22 = vld [vmem:[%s3134_s3 + $0x34] sm:$0xf]  ;;  %v1990_v23 = vld [vmem:[%s3134_s3 + $0x38] sm:$0xf0] }
  0x37   :  { %562 = vmatpush.bf16.msra.mxu0 %v2475_v24  ;;  %v1989_v24 = vor.u32 %v2529_v21, %v1988_v20  ;;  %v2140_v56 = vld [vmem:[#allocation4 + $0xe0] sm:$0xf]  ;;  %v2567_v57 = vld [vmem:[#allocation4 + $0xe4] sm:$0xf0]  ;;  %v2068_v62 = vld [vmem:[#allocation4 + $0x50] sm:$0xf] }
  0x38   :  { %575 = vmatpush.bf16.msra.mxu1 %v2483_v25  ;;  %v1993_v25 = vor.u32 %v2528_v22, %v1990_v23  ;;  %v2141_v61 = vor.u32 %v2567_v57, %v2140_v56  ;;  %v2132_v0 = vld [vmem:[#allocation4 + $0xd0] sm:$0xf]  ;;  %v2565_v1 = vld [vmem:[#allocation4 + $0xd4] sm:$0xf0]  ;;  %v2552_v2 = vld [vmem:[#allocation4 + $0x74] sm:$0xf] }
  0x39   :  { %588 = vmatpush.bf16.msra.mxu2 %v2491_v26  ;;  %v1980_v26 = vld [vmem:[%s3134_s3 + $0x20] sm:$0xf]  ;;  %v2547_v10 = vld [vmem:[#allocation4 + $0x44] sm:$0xf0]  ;;  %v2078_v14 = vld [vmem:[#allocation4 + $0x68] sm:$0xf0] }
  0x3a   :  { %601 = vmatpush.bf16.msra.mxu3 %v2499_v28  ;;  %v2526_v28 = vld [vmem:[%s3134_s3 + $0x24] sm:$0xf]  ;;  %v2661_v4 = vld [vmem:[%s3133_s2] ss:$0 sm:$0xff]  ;;  %v2563_v17 = vld [vmem:[#allocation4 + $0xc4] sm:$0xf0] }
  0x3b   :  { %563 = vmatpush.bf16.msra.mxu0 %v2474_v27  ;;  %v2527_v27 = vld [vmem:[%s3134_s3 + $0x24] sm:$0xf0]  ;;  %v2060_v9 = vld [vmem:[#allocation4 + $0x40] sm:$0xf]  ;;  %v2566_v15 = vld [vmem:[#allocation4 + $0xe4] sm:$0xf] }
  0x3c   :  { %576 = vmatpush.bf16.msra.mxu1 %v2482_v29  ;;  %v1982_v29 = vld [vmem:[%s3134_s3 + $0x28] sm:$0xf0]  ;;  %v1981_v30 = vor.u32 %v2527_v27, %v1980_v26  ;;  %v2124_v16 = vld [vmem:[#allocation4 + $0xc0] sm:$0xf]  ;;  %v2548_v22 = vld [vmem:[#allocation4 + $0x54] sm:$0xf] }
  0x3d   :  { %589 = vmatpush.bf16.msra.mxu2 %v2490_v34  ;;  %v1985_v31 = vor.u32 %v2526_v28, %v1982_v29  ;;  %v2524_v34 = vld [vmem:[%s3134_s3 + $0x14] sm:$0xf]  ;;  %v2134_v27 = vld [vmem:[#allocation4 + $0xd8] sm:$0xf0]  ;;  %v2125_v29 = vor.u32 %v2563_v17, %v2124_v16  ;;  %v2036_v56 = vld [vmem:[#allocation4 + $0x10] sm:$0xf] }
  0x3e   :  { %564 = vmatmul.bf16.vlgmr.msra.gmra.mxu0 %v162_v35  ;;  %602 = vmatpush.bf16.msra.mxu3 %v2498_v38  ;;  %v2564_v26 = vld [vmem:[#allocation4 + $0xd4] sm:$0xf]  ;;  %v2541_v57 = vld [vmem:[#allocation4 + $0x14] sm:$0xf0]  ;;  %v2212_v16 = vld [vmem:[#allocation7 + $0x70] sm:$0xf] }
  0x3f   :  { %608 = vmatpush.bf16.msrb.mxu0 %v2513_v32  ;;  %577 = vmatmul.bf16.vlgmr.msra.gmra.mxu1 %v163_v36  ;;  %v1972_v32 = vld [vmem:[%s3134_s3 + $0x10] sm:$0xf]  ;;  %v1974_v36 = vld [vmem:[%s3134_s3 + $0x18] sm:$0xf0] }
  0x40   :  { %621 = vmatpush.bf16.msrb.mxu1 %v2521_v33  ;;  %590 = vmatmul.bf16.vlgmr.msra.gmra.mxu2 %v164_v42  ;;  %v2525_v33 = vld [vmem:[%s3134_s3 + $0x14] sm:$0xf0]  ;;  %v1977_v37 = vor.u32 %v2524_v34, %v1974_v36  ;;  %v2522_v42 = vld [vmem:[%s3134_s3 + $0x4] sm:$0xf]  ;;  %v2276_v17 = vld [vmem:[#allocation7 + $0xf0] sm:$0xf] }
  0x41   :  { %603 = vmatmul.bf16.vlgmr.msra.gmra.mxu3 %v165_v43  ;;  %738 = vmatpush.bf16.msrb.mxu2 %v2021_v63  ;;  %v1973_v35 = vor.u32 %v2525_v33, %v1972_v32  ;;  %v2549_v63 = vld [vmem:[#allocation4 + $0x54] sm:$0xf0]  ;;  %v2116_v32 = vld [vmem:[#allocation4 + $0xb0] sm:$0xf]  ;;  %v2546_v36 = vld [vmem:[#allocation4 + $0x44] sm:$0xf] }
  0x42   :  { %751 = vmatpush.bf16.msrb.mxu3 %v2025_v3  ;;  %v2086_v3 = vld [vmem:[#allocation4 + $0x78] sm:$0xf0]  ;;  %v2069_v8 = vor.u32 %v2549_v63, %v2068_v62  ;;  %v2561_v34 = vld [vmem:[#allocation4 + $0xb4] sm:$0xf0] }
  0x43   :  { %609 = vmatpush.bf16.msrb.mxu0 %v2512_v40  ;;  %v1964_v40 = vld [vmem:[%s3134_s3] sm:$0xf]  ;;  %v2089_v5 = vor.u32 %v2552_v2, %v2086_v3  ;;  %v2557_v62 = vld [vmem:[#allocation4 + $0x94] sm:$0xf0]  ;;  %v2558_v3 = vld [vmem:[#allocation4 + $0xa4] sm:$0xf] }
  0x44   :  { %622 = vmatpush.bf16.msrb.mxu1 %v2520_v41  ;;  %v2523_v41 = vld [vmem:[%s3134_s3 + $0x4] sm:$0xf0] }
  0x45   :  { %739 = vmatpush.bf16.msrb.mxu2 %v2013_v6  ;;  %v1965_v43 = vor.u32 %v2523_v41, %v1964_v40  ;;  %v2568_v6 = vld [vmem:[#allocation4 + $0xf4] sm:$0xf]  ;;  %v2562_v40 = vld [vmem:[#allocation4 + $0xc4] sm:$0xf]  ;;  %v2126_v41 = vld [vmem:[#allocation4 + $0xc8] sm:$0xf0] }
  0x46   :  { %752 = vmatpush.bf16.msrb.mxu3 %v2017_v7  ;;  %v2150_v7 = vld [vmem:[#allocation4 + $0xf8] sm:$0xf0] }
  0x47   :  { %610 = vmatpush.bf16.msrb.mxu0 %v2511_v44  ;;  %v1966_v44 = vld [vmem:[%s3134_s3 + $0x8] sm:$0xf0]  ;;  %v2153_v11 = vor.u32 %v2568_v6, %v2150_v7  ;;  %v2037_v6 = vor.u32 %v2541_v57, %v2036_v56 }
  0x48   :  { %623 = vmatpush.bf16.msrb.mxu1 %v2519_v45  ;;  %v1969_v45 = vor.u32 %v2522_v42, %v1966_v44  ;;  %v2044_v44 = vld [vmem:[#allocation4 + $0x20] sm:$0xf]  ;;  %v2206_v56 = vld [vmem:[#allocation7 + $0x68] sm:$0xf0] }
  0x49   :  { %740 = vmatpush.bf16.msrb.mxu2 %v2005_v12  ;;  %v2133_v12 = vor.u32 %v2565_v1, %v2132_v0  ;;  %v2542_v0 = vld [vmem:[#allocation4 + $0x24] sm:$0xf]  ;;  %v2046_v1 = vld [vmem:[#allocation4 + $0x28] sm:$0xf0] }
  0x4a   :  { %753 = vmatpush.bf16.msrb.mxu3 %v2009_v13  ;;  %v2550_v13 = vld [vmem:[#allocation4 + $0x64] sm:$0xf] }
  0x4b   :  { %611 = vmatpush.bf16.msrb.mxu0 %v2510_v46  ;;  %v2084_v46 = vld [vmem:[#allocation4 + $0x70] sm:$0xf] }
  0x4c   :  { %624 = vmatpush.bf16.msrb.mxu1 %v2518_v47  ;;  %v2553_v47 = vld [vmem:[#allocation4 + $0x74] sm:$0xf0] }
  0x4d   :  { %741 = vmatpush.bf16.msrb.mxu2 %v1997_v18  ;;  %v2081_v18 = vor.u32 %v2550_v13, %v2078_v14  ;;  %v2555_v13 = vld [vmem:[#allocation4 + $0x84] sm:$0xf0] }
  0x4e   :  { %754 = vmatpush.bf16.msrb.mxu3 %v2001_v19  ;;  %v2142_v19 = vld [vmem:[#allocation4 + $0xe8] sm:$0xf0] }
  0x4f   :  { %612 = vmatpush.bf16.msrb.mxu0 %v2509_v48  ;;  %v2148_v48 = vld [vmem:[#allocation4 + $0xf0] sm:$0xf]  ;;  %v2145_v21 = vor.u32 %v2566_v15, %v2142_v19  ;;  %v2617_v19 = vld [vmem:[#allocation7 + $0xf4] sm:$0xf0] }
  0x50   :  { %625 = vmatpush.bf16.msrb.mxu1 %v2517_v49  ;;  %v2085_v49 = vor.u32 %v2553_v47, %v2084_v46  ;;  %v2108_v46 = vld [vmem:[#allocation4 + $0xa0] sm:$0xf] }
  0x51   :  { %742 = vmatpush.bf16.msrb.mxu2 %v1989_v24  ;;  %v2061_v24 = vor.u32 %v2547_v10, %v2060_v9  ;;  %v2028_v9 = vld [vmem:[#allocation4] sm:$0xf]  ;;  %v2539_v10 = vld [vmem:[#allocation4 + $0x4] sm:$0xf0] }
  0x52   :  { %755 = vmatpush.bf16.msrb.mxu3 %v1993_v25  ;;  %v2070_v25 = vld [vmem:[#allocation4 + $0x58] sm:$0xf0] }
  0x53   :  { %613 = vmatpush.bf16.msrb.mxu0 %v2508_v50  ;;  %v2569_v50 = vld [vmem:[#allocation4 + $0xf4] sm:$0xf0]  ;;  %v2073_v33 = vor.u32 %v2548_v22, %v2070_v25 }
  0x54   :  { %626 = vmatpush.bf16.msrb.mxu1 %v2516_v51  ;;  %v2076_v51 = vld [vmem:[#allocation4 + $0x60] sm:$0xf] }
  0x55   :  { %743 = vmatpush.bf16.msrb.mxu2 %v1981_v30  ;;  %v2052_v30 = vld [vmem:[#allocation4 + $0x30] sm:$0xf] }
  0x56   :  { %756 = vmatpush.bf16.msrb.mxu3 %v1985_v31  ;;  %v2545_v31 = vld [vmem:[#allocation4 + $0x34] sm:$0xf0] }
  0x57   :  { %614 = vmatpush.bf16.msrb.mxu0 %v2507_v52  ;;  %v2551_v52 = vld [vmem:[#allocation4 + $0x64] sm:$0xf0]  ;;  %v2053_v42 = vor.u32 %v2545_v31, %v2052_v30  ;;  %v2268_v31 = vld [vmem:[#allocation7 + $0xe0] sm:$0xf] }
  0x58   :  { %627 = vmatpush.bf16.msrb.mxu1 %v2515_v53  ;;  %v2599_v30 = vld [vmem:[#allocation7 + $0x64] sm:$0xf0] }
  0x59   :  { %744 = vmatpush.bf16.msrb.mxu2 %v1973_v35  ;;  %v2137_v35 = vor.u32 %v2564_v26, %v2134_v27  ;;  %v2204_v27 = vld [vmem:[#allocation7 + $0x60] sm:$0xf] }
  0x5a   :  { %757 = vmatpush.bf16.msrb.mxu3 %v1977_v37  ;;  %v2062_v37 = vld [vmem:[#allocation4 + $0x48] sm:$0xf0] }
  0x5b   :  { %615 = vmatpush.bf16.msrb.mxu0 %v2506_v54  ;;  %v2065_v47 = vor.u32 %v2546_v36, %v2062_v37  ;;  %v2538_v37 = vld [vmem:[#allocation4 + $0x4] sm:$0xf] }
  0x5c   :  { %628 = vmatpush.bf16.msrb.mxu1 %v2514_v55  ;;  %v2149_v55 = vor.u32 %v2569_v50, %v2148_v48  ;;  %v2559_v48 = vld [vmem:[#allocation4 + $0xa4] sm:$0xf0]  ;;  %v2544_v50 = vld [vmem:[#allocation4 + $0x34] sm:$0xf] }
  0x5d   :  { %745 = vmatpush.bf16.msrb.mxu2 %v1965_v43  ;;  %v2117_v43 = vor.u32 %v2561_v34, %v2116_v32  ;;  %v2615_v32 = vld [vmem:[#allocation7 + $0xe4] sm:$0xf0] }
  0x5e   :  { %616 = vmatmul.bf16.vlgmr.msrb.gmra.mxu0 %v166_v58  ;;  %758 = vmatpush.bf16.msrb.mxu3 %v1969_v45  ;;  %v2543_v45 = vld [vmem:[#allocation4 + $0x24] sm:$0xf0] }
  0x5f   :  { %629 = vmatmul.bf16.vlgmr.msrb.gmra.mxu1 %v167_v59  ;;  %966 = vmatpush.bf16.msra.mxu0 %v2085_v49  ;;  %v2077_v59 = vor.u32 %v2551_v52, %v2076_v51  ;;  %v2129_v49 = vor.u32 %v2562_v40, %v2126_v41  ;;  %v2054_v51 = vld [vmem:[#allocation4 + $0x38] sm:$0xf0]  ;;  %v2554_v40 = vld [vmem:[#allocation4 + $0x84] sm:$0xf]  ;;  %v2094_v41 = vld [vmem:[#allocation4 + $0x88] sm:$0xf0] }
  0x60   :  { %979 = vmatpush.bf16.msra.mxu1 %v2149_v55  ;;  %v2109_v55 = vor.u32 %v2559_v48, %v2108_v46  ;;  %v2278_v46 = vld [vmem:[#allocation7 + $0xf8] sm:$0xf0]  ;;  %v2196_v48 = vld [vmem:[#allocation7 + $0x50] sm:$0xf] }
  0x61   :  { %992 = vmatpush.bf16.msra.mxu2 %v2089_v5 }
  0x62   :  { %1005 = vmatpush.bf16.msra.mxu3 %v2153_v11  ;;  %v2049_v11 = vor.u32 %v2542_v0, %v2046_v1  ;;  %v2595_v0 = vld [vmem:[#allocation7 + $0x44] sm:$0xf0]  ;;  %v2252_v1 = vld [vmem:[#allocation7 + $0xc0] sm:$0xf] }
  0x63   :  { %967 = vmatpush.bf16.msra.mxu0 %v2077_v59  ;;  %v2100_v59 = vld [vmem:[#allocation4 + $0x90] sm:$0xf] }
  0x64   :  { %980 = vmatpush.bf16.msra.mxu1 %v2141_v61  ;;  %v2057_v61 = vor.u32 %v2544_v50, %v2054_v51  ;;  %v2260_v51 = vld [vmem:[#allocation7 + $0xd0] sm:$0xf] }
  0x65   :  { %993 = vmatpush.bf16.msra.mxu2 %v2081_v18  ;;  %v2029_v18 = vor.u32 %v2539_v10, %v2028_v9  ;;  %v2609_v9 = vld [vmem:[#allocation7 + $0xb4] sm:$0xf0] }
  0x66   :  { %1006 = vmatpush.bf16.msra.mxu3 %v2145_v21  ;;  %v2038_v21 = vld [vmem:[#allocation4 + $0x18] sm:$0xf0] }
  0x67   :  { %968 = vmatpush.bf16.msra.mxu0 %v2069_v8  ;;  %v2101_v8 = vor.u32 %v2557_v62, %v2100_v59  ;;  %v2614_v59 = vld [vmem:[#allocation7 + $0xe4] sm:$0xf] }
  0x68   :  { %981 = vmatpush.bf16.msra.mxu1 %v2133_v12  ;;  %v2092_v12 = vld [vmem:[#allocation4 + $0x80] sm:$0xf] }
  0x69   :  { %994 = vmatpush.bf16.msra.mxu2 %v2073_v33  ;;  %v2093_v25 = vor.u32 %v2555_v13, %v2092_v12  ;;  %v2172_v12 = vld [vmem:[#allocation7 + $0x20] sm:$0xf]  ;;  %v2591_v13 = vld [vmem:[#allocation7 + $0x24] sm:$0xf0] }
  0x6a   :  { %1007 = vmatpush.bf16.msra.mxu3 %v2137_v35 }
  0x6b   :  { %969 = vmatpush.bf16.msra.mxu0 %v2061_v24  ;;  %v2102_v24 = vld [vmem:[#allocation4 + $0x98] sm:$0xf0] }
  0x6c   :  { %982 = vmatpush.bf16.msra.mxu1 %v2125_v29  ;;  %v2277_v29 = vor.u32 %v2617_v19, %v2276_v17  ;;  %v2596_v17 = vld [vmem:[#allocation7 + $0x54] sm:$0xf] }
  0x6d   :  { %995 = vmatpush.bf16.msra.mxu2 %v2065_v47  ;;  %v2269_v47 = vor.u32 %v2615_v32, %v2268_v31  ;;  %v2612_v19 = vld [vmem:[#allocation7 + $0xd4] sm:$0xf] }
  0x6e   :  { %1008 = vmatpush.bf16.msra.mxu3 %v2129_v49  ;;  %v2597_v49 = vld [vmem:[#allocation7 + $0x54] sm:$0xf0] }
  0x6f   :  { %970 = vmatpush.bf16.msra.mxu0 %v2053_v42  ;;  %v2600_v42 = vld [vmem:[#allocation7 + $0x74] sm:$0xf]  ;;  %v2197_v57 = vor.u32 %v2597_v49, %v2196_v48  ;;  %v2590_v49 = vld [vmem:[#allocation7 + $0x24] sm:$0xf] }
  0x70   :  { %983 = vmatpush.bf16.msra.mxu1 %v2117_v43  ;;  %v2214_v43 = vld [vmem:[#allocation7 + $0x78] sm:$0xf0] }
  0x71   :  { %996 = vmatpush.bf16.msra.mxu2 %v2057_v61  ;;  %v2270_v61 = vld [vmem:[#allocation7 + $0xe8] sm:$0xf0] }
  0x74   :  { %984 = vmatpush.bf16.msra.mxu1 %v2109_v55  ;;  %v2598_v55 = vld [vmem:[#allocation7 + $0x64] sm:$0xf] }
  0x75   :  { %997 = vmatpush.bf16.msra.mxu2 %v2049_v11 }
  0x78   :  { %985 = vmatpush.bf16.msra.mxu1 %v2101_v8  ;;  %v2244_v8 = vld [vmem:[#allocation7 + $0xb0] sm:$0xf] }
  0x79   :  { %v2245_v11 = vor.u32 %v2609_v9, %v2244_v8 }
  0x7c   :  { %986 = vmatpush.bf16.msra.mxu1 %v2093_v25  ;;  %v2228_v25 = vld [vmem:[#allocation7 + $0x90] sm:$0xf] }
  0x80   :  { %1241 = vmatpush.bf16.msrb.mxu1 %v2277_v29  ;;  %v2594_v29 = vld [vmem:[#allocation7 + $0x44] sm:$0xf] }
  0x84   :  { %1242 = vmatpush.bf16.msrb.mxu1 %v2269_v47  ;;  %v2246_v47 = vld [vmem:[#allocation7 + $0xb8] sm:$0xf0] }
  0xbb   :  { %v565_v38 = vpop.f32.mrf.mxu0 }
  0xbc   :  { %v3063_v39 = vpop.f32.mrf.mxu1  ;;  %v566_v20 = vadd.f32 %v2661_v4, %v565_v38 }
  0xbe   :  { %v579_v38 = vadd.f32 %v3063_v39, %v566_v20  ;;  %v2118_v39 = vld [vmem:[#allocation4 + $0xb8] sm:$0xf0]  ;;  %v2540_v20 = vld [vmem:[#allocation4 + $0x14] sm:$0xf] }
  0xbf   :  { %v2041_v33 = vor.u32 %v2540_v20, %v2038_v21  ;;  %v2262_v21 = vld [vmem:[#allocation7 + $0xd8] sm:$0xf0] }
  0xc1   :  { %998 = vmatpush.bf16.msra.mxu2 %v2041_v33  ;;  %v2610_v33 = vld [vmem:[#allocation7 + $0xc4] sm:$0xf] }
  0xc3   :  { %v567_v53 = vpop.f32.mrf.mxu0  ;;  %v3077_v58 = vpop.f32.mrf.mxu2 }
  0xc4   :  { %v580_v54 = vpop.f32.mrf.mxu1  ;;  %v3079_v60 = vpop.f32.mrf.mxu3  ;;  %v592_v52 = vadd.f32 %v3077_v58, %v579_v38  ;;  %v2560_v53 = vld [vmem:[#allocation4 + $0xb4] sm:$0xf]  ;;  %v2110_v58 = vld [vmem:[#allocation4 + $0xa8] sm:$0xf0] }
  0xc5   :  { %v2045_v54 = vor.u32 %v2543_v45, %v2044_v44  ;;  %v2121_v63 = vor.u32 %v2560_v53, %v2118_v39  ;;  %v2113_v14 = vor.u32 %v2558_v3, %v2110_v58  ;;  %v2030_v38 = vld [vmem:[#allocation4 + $0x8] sm:$0xf0]  ;;  %v2205_v44 = vor.u32 %v2599_v30, %v2204_v27  ;;  %v2616_v45 = vld [vmem:[#allocation7 + $0xf4] sm:$0xf]  ;;  %v2605_v27 = vld [vmem:[#allocation7 + $0x94] sm:$0xf0] }
  0xc6   :  { %v605_v2 = vadd.f32 %v3079_v60, %v592_v52  ;;  %v2601_v60 = vld [vmem:[#allocation7 + $0x74] sm:$0xf0]  ;;  %v2033_v50 = vor.u32 %v2538_v37, %v2030_v38  ;;  %v2097_v53 = vor.u32 %v2554_v40, %v2094_v41  ;;  %v2217_v39 = vor.u32 %v2600_v42, %v2214_v43  ;;  %v2190_v30 = vld [vmem:[#allocation7 + $0x48] sm:$0xf0]  ;;  %v2587_v37 = vld [vmem:[#allocation7 + $0x4] sm:$0xf0] }
  0xc7   :  { %971 = vmatpush.bf16.msra.mxu0 %v2045_v54  ;;  %1009 = vmatpush.bf16.msra.mxu3 %v2121_v63  ;;  %v2213_v26 = vor.u32 %v2601_v60, %v2212_v16  ;;  %v2613_v52 = vld [vmem:[#allocation7 + $0xd4] sm:$0xf0]  ;;  %v2281_v54 = vor.u32 %v2616_v45, %v2278_v46  ;;  %v2188_v63 = vld [vmem:[#allocation7 + $0x40] sm:$0xf]  ;;  %v2209_v3 = vor.u32 %v2598_v55, %v2206_v56  ;;  %v2603_v41 = vld [vmem:[#allocation7 + $0x84] sm:$0xf0] }
  0xc8   :  { %v2261_v62 = vor.u32 %v2613_v52, %v2260_v51  ;;  %999 = vmatpush.bf16.msra.mxu2 %v2033_v50  ;;  %v2273_v58 = vor.u32 %v2614_v59, %v2270_v61  ;;  %v2173_v16 = vor.u32 %v2591_v13, %v2172_v12  ;;  %v2229_v31 = vor.u32 %v2605_v27, %v2228_v25  ;;  %v2220_v38 = vld [vmem:[#allocation7 + $0x80] sm:$0xf]  ;;  %v2592_v42 = vld [vmem:[#allocation7 + $0x34] sm:$0xf]  ;;  %v2182_v43 = vld [vmem:[#allocation7 + $0x38] sm:$0xf0] }
  0xc9   :  { %v2193_v32 = vor.u32 %v2594_v29, %v2190_v30  ;;  %v2185_v45 = vor.u32 %v2592_v42, %v2182_v43  ;;  %v2608_v46 = vld [vmem:[#allocation7 + $0xb4] sm:$0xf]  ;;  %v2174_v50 = vld [vmem:[#allocation7 + $0x28] sm:$0xf0]  ;;  %v2606_v51 = vld [vmem:[#allocation7 + $0xa4] sm:$0xf] }
  0xca   :  { %1243 = vmatpush.bf16.msrb.mxu1 %v2261_v62  ;;  %v2249_v48 = vor.u32 %v2608_v46, %v2246_v47  ;;  %v2177_v52 = vor.u32 %v2590_v49, %v2174_v50  ;;  %v2166_v55 = vld [vmem:[#allocation7 + $0x18] sm:$0xf0]  ;;  %v2604_v56 = vld [vmem:[#allocation7 + $0x94] sm:$0xf]  ;;  %v2586_v62 = vld [vmem:[#allocation7 + $0x4] sm:$0xf] }
  0xcb   :  { %v593_v23 = vpop.f32.mrf.mxu2  ;;  %972 = vmatpush.bf16.msra.mxu0 %v2037_v6  ;;  %1010 = vmatpush.bf16.msra.mxu3 %v2113_v14  ;;  %v2180_v6 = vld [vmem:[#allocation7 + $0x30] sm:$0xf]  ;;  %v2236_v14 = vld [vmem:[#allocation7 + $0xa0] sm:$0xf]  ;;  %v2230_v59 = vld [vmem:[#allocation7 + $0x98] sm:$0xf0] }
  0xcc   :  { %v606_v28 = vpop.f32.mrf.mxu3  ;;  %v2556_v23 = vld [vmem:[#allocation4 + $0x94] sm:$0xf]  ;;  %v2233_v61 = vor.u32 %v2604_v56, %v2230_v59  ;;  %v2342_v13 = vld [vmem:[#allocation6 + $0x78] sm:$0xf0]  ;;  %v2324_v27 = vld [vmem:[#allocation6 + $0x50] sm:$0xf] }
  0xcd   :  { %v2105_v36 = vor.u32 %v2556_v23, %v2102_v24  ;;  %v2164_v23 = vld [vmem:[#allocation7 + $0x10] sm:$0xf]  ;;  %v2589_v24 = vld [vmem:[#allocation7 + $0x14] sm:$0xf0]  ;;  %v2584_v12 = vld [vmem:[#allocation6 + $0x74] sm:$0xf] }
  0xce   :  { %v2581_v29 = vld [vmem:[#allocation6 + $0x54] sm:$0xf0]  ;;  %v2580_v30 = vld [vmem:[#allocation6 + $0x54] sm:$0xf]  ;;  %v2300_v47 = vld [vmem:[#allocation6 + $0x20] sm:$0xf] }
  0xcf   :  { %973 = vmatpush.bf16.msra.mxu0 %v2029_v18  ;;  %1011 = vmatpush.bf16.msra.mxu3 %v2105_v36  ;;  %v2198_v18 = vld [vmem:[#allocation7 + $0x58] sm:$0xf0]  ;;  %v2156_v36 = vld [vmem:[#allocation7] sm:$0xf]  ;;  %v2577_v42 = vld [vmem:[#allocation6 + $0x34] sm:$0xf0] }
  0xd0   :  { %v2201_v20 = vor.u32 %v2596_v17, %v2198_v18  ;;  %v2157_v40 = vor.u32 %v2587_v37, %v2156_v36  ;;  %v2345_v18 = vor.u32 %v2584_v12, %v2342_v13  ;;  %v2578_v36 = vld [vmem:[#allocation6 + $0x44] sm:$0xf]  ;;  %v2318_v37 = vld [vmem:[#allocation6 + $0x48] sm:$0xf0]  ;;  %v2576_v43 = vld [vmem:[#allocation6 + $0x34] sm:$0xf] }
  0xd1   :  { %v2574_v49 = vld [vmem:[#allocation6 + $0x24] sm:$0xf]  ;;  %v2302_v50 = vld [vmem:[#allocation6 + $0x28] sm:$0xf0]  ;;  %v2284_v59 = vld [vmem:[#allocation6] sm:$0xf] }
  0xd3   :  { %1228 = vmatpush.bf16.msrb.mxu0 %v2213_v26  ;;  %1012 = vmatpush.bf16.msra.mxu3 %v2097_v53  ;;  %v2165_v26 = vor.u32 %v2589_v24, %v2164_v23  ;;  %v2238_v53 = vld [vmem:[#allocation7 + $0xa8] sm:$0xf0] }
  0xd7   :  { %1229 = vmatpush.bf16.msrb.mxu0 %v2205_v44  ;;  %v2221_v44 = vor.u32 %v2603_v41, %v2220_v38  ;;  %v2308_v41 = vld [vmem:[#allocation6 + $0x30] sm:$0xf] }
  0xdb   :  { %v617_v4 = vpop.f32.mrf.mxu0  ;;  %1230 = vmatpush.bf16.msrb.mxu0 %v2197_v57 }
  0xdc   :  { %v630_v5 = vpop.f32.mrf.mxu1  ;;  %v618_v7 = vadd.f32 %v617_v4, %v605_v2  ;;  %v2611_v2 = vld [vmem:[#allocation7 + $0xc4] sm:$0xf0]  ;;  %v2189_v4 = vor.u32 %v2595_v0, %v2188_v63  ;;  %v2158_v63 = vld [vmem:[#allocation7 + $0x8] sm:$0xf0]  ;;  %v2602_v0 = vld [vmem:[#allocation7 + $0x84] sm:$0xf] }
  0xde   :  { %v631_v15 = vadd.f32 %v630_v5, %v618_v7  ;;  %v2253_v5 = vor.u32 %v2611_v2, %v2252_v1  ;;  %v2593_v7 = vld [vmem:[#allocation7 + $0x34] sm:$0xf0]  ;;  %v2161_v1 = vor.u32 %v2586_v62, %v2158_v63  ;;  %v2222_v2 = vld [vmem:[#allocation7 + $0x88] sm:$0xf0]  ;;  %v2570_v62 = vld [vmem:[#allocation6 + $0x4] sm:$0xf] }
  0xdf   :  { %1231 = vmatpush.bf16.msrb.mxu0 %v2189_v4  ;;  %v2181_v10 = vor.u32 %v2593_v7, %v2180_v6  ;;  %v2286_v63 = vld [vmem:[#allocation6 + $0x8] sm:$0xf0] }
  0xe0   :  { %v634_v22 = vmax.f32 %v631_v15, 0.0  ;;  %1244 = vmatpush.bf16.msrb.mxu1 %v2253_v5  ;;  %v2607_v15 = vld [vmem:[#allocation7 + $0xa4] sm:$0xf0] }
  0xe1   :  { %v2237_v60 = vor.u32 %v2607_v15, %v2236_v14 }
  0xe2   :  { %v3087_v28 = vpack.c.bf16 %v634_v22, %v634_v22  ;;  %v2265_v22 = vor.u32 %v2612_v19, %v2262_v21  ;;  %v2332_v19 = vld [vmem:[#allocation6 + $0x60] sm:$0xf]  ;;  %v2582_v21 = vld [vmem:[#allocation6 + $0x64] sm:$0xf] }
  0xe3   :  { %v619_v34 = vpop.f32.mrf.mxu0  ;;  %1232 = vmatpush.bf16.msrb.mxu0 %v2181_v10  ;;  %v2340_v10 = vld [vmem:[#allocation6 + $0x70] sm:$0xf] }
  0xe4   :  { %v632_v35 = vpop.f32.mrf.mxu1  ;;  %746 = vmatmul.bf16.vlgmr.msrb.gmra.mxu2 %v3087_v28  ;;  %759 = vmatmul.bf16.vlgmr.msrb.gmra.mxu3 %v3087_v28  ;;  %v2254_v34 = vld [vmem:[#allocation7 + $0xc8] sm:$0xf0] }
  0xe5   :  { %1254 = vmatpush.bf16.msrb.mxu2 %v2217_v39  ;;  %1267 = vmatpush.bf16.msrb.mxu3 %v2281_v54  ;;  %v2257_v35 = vor.u32 %v2610_v33, %v2254_v34  ;;  %v2241_v39 = vor.u32 %v2606_v51, %v2238_v53  ;;  %v2588_v54 = vld [vmem:[#allocation7 + $0x14] sm:$0xf]  ;;  %v2316_v34 = vld [vmem:[#allocation6 + $0x40] sm:$0xf]  ;;  %v2292_v53 = vld [vmem:[#allocation6 + $0x10] sm:$0xf] }
  0xe6   :  { %1245 = vmatpush.bf16.msrb.mxu1 %v2245_v11  ;;  %v2169_v57 = vor.u32 %v2588_v54, %v2166_v55  ;;  %v2585_v11 = vld [vmem:[#allocation6 + $0x74] sm:$0xf0]  ;;  %v2572_v54 = vld [vmem:[#allocation6 + $0x14] sm:$0xf]  ;;  %v2294_v55 = vld [vmem:[#allocation6 + $0x18] sm:$0xf0] }
  0xe7   :  { %1233 = vmatpush.bf16.msrb.mxu0 %v2173_v16  ;;  %v2341_v17 = vor.u32 %v2585_v11, %v2340_v10 }
  0xe9   :  { %1255 = vmatpush.bf16.msrb.mxu2 %v2209_v3  ;;  %1268 = vmatpush.bf16.msrb.mxu3 %v2273_v58  ;;  %v2225_v3 = vor.u32 %v2602_v0, %v2222_v2  ;;  %v652_v58 = vld [vmem:[%s3135_s4] sm:$0x3] }
  0xea   :  { %1246 = vmatpush.bf16.msrb.mxu1 %v2237_v60  ;;  %v654_v4 = vperm.slane %v652_v58, 0  ;;  %v655_v5 = vperm.slane %v652_v58, 1  ;;  %v800_v2 = vld [vmem:[%s3137_s6] sm:$0x3] }
  0xeb   :  { %1234 = vmatpush.bf16.msrb.mxu0 %v2165_v26 }
  0xed   :  { %1256 = vmatpush.bf16.msrb.mxu2 %v2201_v20  ;;  %1269 = vmatpush.bf16.msrb.mxu3 %v2265_v22  ;;  %v2583_v20 = vld [vmem:[#allocation6 + $0x64] sm:$0xf0]  ;;  %v2334_v22 = vld [vmem:[#allocation6 + $0x68] sm:$0xf0] }
  0xee   :  { %1247 = vmatpush.bf16.msrb.mxu1 %v2229_v31  ;;  %v2333_v25 = vor.u32 %v2583_v20, %v2332_v19  ;;  %v2337_v26 = vor.u32 %v2582_v21, %v2334_v22  ;;  %v2326_v31 = vld [vmem:[#allocation6 + $0x58] sm:$0xf0] }
  0xef   :  { %1235 = vmatpush.bf16.msrb.mxu0 %v2157_v40  ;;  %v2329_v33 = vor.u32 %v2580_v30, %v2326_v31  ;;  %v2321_v40 = vor.u32 %v2578_v36, %v2318_v37  ;;  %v2641_v21 = vld [vmem:[#allocation9 + $0x38] sm:$0xff]  ;;  %v1386_v30 = vld [vmem:[%s3140_s9] sm:$0x3] }
  0xf0   :  { %v2649_v22 = vld [vmem:[#allocation9 + $0x78] sm:$0xff] }
  0xf1   :  { %1257 = vmatpush.bf16.msrb.mxu2 %v2193_v32  ;;  %1270 = vmatpush.bf16.msrb.mxu3 %v2257_v35  ;;  %v2325_v32 = vor.u32 %v2581_v29, %v2324_v27  ;;  %v2579_v35 = vld [vmem:[#allocation6 + $0x44] sm:$0xf0] }
  0xf2   :  { %1248 = vmatpush.bf16.msrb.mxu1 %v2221_v44  ;;  %v2317_v38 = vor.u32 %v2579_v35, %v2316_v34  ;;  %v2310_v44 = vld [vmem:[#allocation6 + $0x38] sm:$0xf0]  ;;  %v1388_v34 = vperm.slane %v1386_v30, 0 }
  0xf3   :  { %v2313_v46 = vor.u32 %v2576_v43, %v2310_v44 }
  0xf5   :  { %1258 = vmatpush.bf16.msrb.mxu2 %v2185_v45  ;;  %1271 = vmatpush.bf16.msrb.mxu3 %v2249_v48  ;;  %v2309_v45 = vor.u32 %v2577_v42, %v2308_v41  ;;  %v2575_v48 = vld [vmem:[#allocation6 + $0x24] sm:$0xf0]  ;;  %v1389_v42 = vperm.slane %v1386_v30, 1 }
  0xf6   :  { %v2301_v51 = vor.u32 %v2575_v48, %v2300_v47  ;;  %v2639_v48 = vld [vmem:[#allocation9 + $0x28] sm:$0xff] }
  0xf9   :  { %1259 = vmatpush.bf16.msrb.mxu2 %v2177_v52  ;;  %1272 = vmatpush.bf16.msrb.mxu3 %v2241_v39  ;;  %v2305_v52 = vor.u32 %v2574_v49, %v2302_v50  ;;  %v2573_v39 = vld [vmem:[#allocation6 + $0x14] sm:$0xf0]  ;;  %v2647_v49 = vld [vmem:[#allocation9 + $0x68] sm:$0xff]  ;;  %v2638_v50 = vld [vmem:[#allocation9 + $0x20] sm:$0xff] }
  0xfa   :  { %v2293_v56 = vor.u32 %v2573_v39, %v2292_v53  ;;  %v2645_v53 = vld [vmem:[#allocation9 + $0x58] sm:$0xff]  ;;  %v2636_v39 = vld [vmem:[#allocation9 + $0x10] sm:$0xff] }
  0xfd   :  { %1260 = vmatpush.bf16.msrb.mxu2 %v2169_v57  ;;  %1273 = vmatpush.bf16.msrb.mxu3 %v2233_v61  ;;  %v2297_v57 = vor.u32 %v2572_v54, %v2294_v55  ;;  %v2571_v61 = vld [vmem:[#allocation6 + $0x4] sm:$0xf0]  ;;  %v2644_v54 = vld [vmem:[#allocation9 + $0x50] sm:$0xff]  ;;  %v2625_v55 = vld [vmem:[#allocation10 + $0x38] sm:$0xff] }
  0xfe   :  { %v2285_v0 = vor.u32 %v2571_v61, %v2284_v59  ;;  %v2624_v59 = vld [vmem:[#allocation10 + $0x30] sm:$0xff]  ;;  %v2634_v61 = vld [vmem:[#allocation9] sm:$0xff] }
 0x101   :  { %1261 = vmatpush.bf16.msrb.mxu2 %v2161_v1  ;;  %1274 = vmatpush.bf16.msrb.mxu3 %v2225_v3  ;;  %v2289_v1 = vor.u32 %v2570_v62, %v2286_v63  ;;  %v802_v3 = vperm.slane %v800_v2, 0  ;;  %v2642_v62 = vld [vmem:[#allocation9 + $0x40] sm:$0xff]  ;;  %v2623_v63 = vld [vmem:[#allocation10 + $0x28] sm:$0xff] }
 0x167   :  { %v747_v6 = vpop.f32.mrf.mxu2  ;;  %v760_v7 = vpop.f32.mrf.mxu3 }
 0x168   :  { %v748_v8 = vadd.f32 %v747_v6, %v654_v4  ;;  %v761_v9 = vadd.f32 %v760_v7, %v655_v5  ;;  %v803_v6 = vperm.slane %v800_v2, 1  ;;  %v2632_v2 = vld [vmem:[#allocation12 + $0x30] sm:$0xff] }
 0x16a   :  { %v764_v14 = vmax.f32 %v748_v8, 0.0  ;;  %v765_v15 = vmax.f32 %v761_v9, 0.0 }
 0x16c   :  { %v766_v16 = vpack.c.bf16 %v764_v14, %v764_v14  ;;  %v767_v60 = vpack.c.bf16 %v765_v15, %v765_v15 }
 0x16e   :  { %974 = vmatmul.bf16.vlgmr.msra.gmra.mxu0 %v766_v16  ;;  %987 = vmatmul.bf16.vlgmr.msra.gmra.mxu1 %v767_v60 }
 0x16f   :  { %1000 = vmatmul.bf16.vlgmr.msra.gmra.mxu2 %v766_v16  ;;  %1013 = vmatmul.bf16.vlgmr.msra.gmra.mxu3 %v767_v60  ;;  %v749_v23 = vpop.f32.mrf.mxu2  ;;  %v762_v24 = vpop.f32.mrf.mxu3 }
 0x170   :  { %1360 = vmatpush.bf16.msra.mxu0 %v2341_v17  ;;  %1373 = vmatpush.bf16.msra.mxu1 %v2345_v18  ;;  %v2640_v23 = vld [vmem:[#allocation9 + $0x30] sm:$0xff] }
 0x171   :  { %v2648_v24 = vld [vmem:[#allocation9 + $0x70] sm:$0xff]  ;;  %1493 = vmatpush.bf16.msra.mxu2 %v2625_v55 }
 0x174   :  { %1361 = vmatpush.bf16.msra.mxu0 %v2333_v25  ;;  %1374 = vmatpush.bf16.msra.mxu1 %v2337_v26 }
 0x175   :  { %1494 = vmatpush.bf16.msra.mxu2 %v2624_v59 }
 0x178   :  { %1362 = vmatpush.bf16.msra.mxu0 %v2325_v32  ;;  %1375 = vmatpush.bf16.msra.mxu1 %v2329_v33 }
 0x179   :  { %1495 = vmatpush.bf16.msra.mxu2 %v2623_v63 }
 0x17c   :  { %1363 = vmatpush.bf16.msra.mxu0 %v2317_v38  ;;  %1376 = vmatpush.bf16.msra.mxu1 %v2321_v40 }
 0x17e   :  { %1236 = vmatmul.bf16.vlgmr.msrb.gmra.mxu0 %v766_v16  ;;  %1249 = vmatmul.bf16.vlgmr.msrb.gmra.mxu1 %v767_v60 }
 0x17f   :  { %1262 = vmatmul.bf16.vlgmr.msrb.gmra.mxu2 %v766_v16  ;;  %1275 = vmatmul.bf16.vlgmr.msrb.gmra.mxu3 %v767_v60 }
 0x180   :  { %1364 = vmatpush.bf16.msra.mxu0 %v2309_v45  ;;  %1377 = vmatpush.bf16.msra.mxu1 %v2313_v46 }
 0x184   :  { %1365 = vmatpush.bf16.msra.mxu0 %v2301_v51  ;;  %1378 = vmatpush.bf16.msra.mxu1 %v2305_v52  ;;  %v2646_v51 = vld [vmem:[#allocation9 + $0x60] sm:$0xff]  ;;  %v2637_v52 = vld [vmem:[#allocation9 + $0x18] sm:$0xff] }
 0x188   :  { %1366 = vmatpush.bf16.msra.mxu0 %v2293_v56  ;;  %1379 = vmatpush.bf16.msra.mxu1 %v2297_v57  ;;  %v2635_v56 = vld [vmem:[#allocation9 + $0x8] sm:$0xff] }
 0x189   :  { %v2643_v57 = vld [vmem:[#allocation9 + $0x48] sm:$0xff] }
 0x18c   :  { %1367 = vmatpush.bf16.msra.mxu0 %v2285_v0  ;;  %1380 = vmatpush.bf16.msra.mxu1 %v2289_v1  ;;  %v2633_v0 = vld [vmem:[#allocation12 + $0x38] sm:$0xff]  ;;  %v2622_v1 = vld [vmem:[#allocation10 + $0x20] sm:$0xff] }
 0x18d   :  { %1590 = vmatpush.bf16.msra.mxu3 %v2633_v0  ;;  %1496 = vmatpush.bf16.msra.mxu2 %v2622_v1 }
 0x18f   :  { %1368 = vmatmul.bf16.vlgmr.msra.gmra.mxu0 %v3087_v28  ;;  %1381 = vmatmul.bf16.vlgmr.msra.gmra.mxu1 %v3087_v28 }
 0x190   :  { %1734 = vmatpush.bf16.msrb.mxu0 %v2641_v21  ;;  %1747 = vmatpush.bf16.msrb.mxu1 %v2649_v22 }
 0x191   :  { %1591 = vmatpush.bf16.msra.mxu3 %v2632_v2 }
 0x194   :  { %1735 = vmatpush.bf16.msrb.mxu0 %v2640_v23  ;;  %1748 = vmatpush.bf16.msrb.mxu1 %v2648_v24 }
 0x198   :  { %1736 = vmatpush.bf16.msrb.mxu0 %v2639_v48  ;;  %1749 = vmatpush.bf16.msrb.mxu1 %v2647_v49 }
 0x19c   :  { %1737 = vmatpush.bf16.msrb.mxu0 %v2638_v50  ;;  %1750 = vmatpush.bf16.msrb.mxu1 %v2646_v51 }
 0x1a0   :  { %1738 = vmatpush.bf16.msrb.mxu0 %v2637_v52  ;;  %1751 = vmatpush.bf16.msrb.mxu1 %v2645_v53 }
 0x1a4   :  { %1739 = vmatpush.bf16.msrb.mxu0 %v2636_v39  ;;  %1752 = vmatpush.bf16.msrb.mxu1 %v2644_v54 }
 0x1a8   :  { %1740 = vmatpush.bf16.msrb.mxu0 %v2635_v56  ;;  %1753 = vmatpush.bf16.msrb.mxu1 %v2643_v57 }
 0x1ac   :  { %1741 = vmatpush.bf16.msrb.mxu0 %v2634_v61  ;;  %1754 = vmatpush.bf16.msrb.mxu1 %v2642_v62 }
 0x1eb   :  { %v975_v58 = vpop.f32.mrf.mxu0  ;;  %v988_v4 = vpop.f32.mrf.mxu1 }
 0x1ec   :  { %v976_v5 = vadd.f32 %v975_v58, %v802_v3  ;;  %v2621_v3 = vld [vmem:[#allocation10 + $0x18] sm:$0xff]  ;;  %v2631_v58 = vld [vmem:[#allocation12 + $0x28] sm:$0xff] }
 0x1ed   :  { %1497 = vmatpush.bf16.msra.mxu2 %v2621_v3  ;;  %1592 = vmatpush.bf16.msra.mxu3 %v2631_v58 }
 0x1ee   :  { %v989_v7 = vadd.f32 %v988_v4, %v976_v5 }
 0x1f0   :  { %v3099_v13 = vmax.f32 %v989_v7, 0.0  ;;  %v2630_v7 = vld [vmem:[#allocation12 + $0x20] sm:$0xff] }
 0x1f1   :  { %1593 = vmatpush.bf16.msra.mxu3 %v2630_v7 }
 0x1f2   :  { %v1001_v8 = vpop.f32.mrf.mxu2  ;;  %v1014_v9 = vpop.f32.mrf.mxu3  ;;  %v1394_v28 = vmul.f32 %v3099_v13, %v3099_v13 }
 0x1f3   :  { %v1002_v10 = vadd.f32 %v1001_v8, %v803_v6  ;;  %v977_v11 = vpop.f32.mrf.mxu0  ;;  %v990_v12 = vpop.f32.mrf.mxu1  ;;  %v2620_v6 = vld [vmem:[#allocation10 + $0x10] sm:$0xff]  ;;  %v2619_v8 = vld [vmem:[#allocation10 + $0x8] sm:$0xff] }
 0x1f4   :  { %1498 = vmatpush.bf16.msra.mxu2 %v2620_v6  ;;  %v2618_v12 = vld [vmem:[#allocation10] sm:$0xff] }
 0x1f5   :  { %v1015_v14 = vadd.f32 %v1014_v9, %v1002_v10  ;;  %v2629_v9 = vld [vmem:[#allocation12 + $0x18] sm:$0xff] }
 0x1f6   :  { %1594 = vmatpush.bf16.msra.mxu3 %v2629_v9 }
 0x1f7   :  { %v3101_v15 = vmax.f32 %v1015_v14, 0.0  ;;  %v2628_v14 = vld [vmem:[#allocation12 + $0x10] sm:$0xff] }
 0x1f8   :  { %1499 = vmatpush.bf16.msra.mxu2 %v2619_v8 }
 0x1f9   :  { %v1395_v16 = vmul.f32 %v3101_v15, %v3101_v15 }
 0x1fa   :  { %v1003_v60 = vpop.f32.mrf.mxu2  ;;  %v1016_v17 = vpop.f32.mrf.mxu3  ;;  %1595 = vmatpush.bf16.msra.mxu3 %v2628_v14 }
 0x1fb   :  { %v1237_v18 = vpop.f32.mrf.mxu0  ;;  %v1250_v19 = vpop.f32.mrf.mxu1  ;;  %v1396_v20 = vadd.f32 %v1395_v16, %v1394_v28  ;;  %v2627_v60 = vld [vmem:[#allocation12 + $0x8] sm:$0xff] }
 0x1fc   :  { %v1251_v33 = vadd.f32 %v1250_v19, %v1237_v18  ;;  %1500 = vmatpush.bf16.msra.mxu2 %v2618_v12  ;;  %v2626_v19 = vld [vmem:[#allocation12] sm:$0xff] }
 0x1fd   :  { %1397 = vadd.xlane.f32.xlu1 %v1396_v20 }
 0x1fe   :  { %1596 = vmatpush.bf16.msra.mxu3 %v2627_v60 }
 0x202   :  { %v1263_v25 = vpop.f32.mrf.mxu2  ;;  %v1276_v26 = vpop.f32.mrf.mxu3  ;;  %1597 = vmatpush.bf16.msra.mxu3 %v2626_v19 }
 0x203   :  { %v1239_v27 = vpop.f32.mrf.mxu0  ;;  %v1252_v29 = vpop.f32.mrf.mxu1  ;;  %v1277_v38 = vadd.f32 %v1276_v26, %v1263_v25 }
 0x20a   :  { %v1265_v31 = vpop.f32.mrf.mxu2  ;;  %v1278_v32 = vpop.f32.mrf.mxu3 }
 0x20c   :  { %v1369_v35 = vpop.f32.mrf.mxu0  ;;  %v1382_v36 = vpop.f32.mrf.mxu1 }
 0x20d   :  { %v1370_v37 = vadd.f32 %v1369_v35, %v1251_v33  ;;  %v1383_v41 = vadd.f32 %v1382_v36, %v1277_v38 }
 0x20f   :  { %v3110_v40 = vadd.f32 %v1388_v34, %v1370_v37  ;;  %v3114_v46 = vadd.f32 %v1389_v42, %v1383_v41 }
 0x211   :  { %v1413_v43 = vmul.f32 %v3110_v40, %v3110_v40  ;;  %v1510_v47 = vmul.f32 %v3114_v46, %v3114_v46 }
 0x213   :  { %1414 = vadd.xlane.f32.xlu0 %v1413_v43 }
 0x214   :  { %v1371_v44 = vpop.f32.mrf.mxu0  ;;  %v1384_v45 = vpop.f32.mrf.mxu1 }
 0x21b   :  { %1511 = vadd.xlane.f32.xlu0 %v1510_v47 }
 0x270   :  { %v1398_v4 = vpop.xlane.xlu1 %1397 }
 0x271   :  { %v1399_v5 = vadd.f32 1e-12, %v1398_v4 }
 0x273   :  { %2663 = vrsqrt.f32 %v1399_v5  ;;  %vm1406_vm1 = vweird.f32 %v1399_v5 }
 0x279   :  { %v2664_v10 = vpop.eup %2663 }
 0x27a   :  { %v1401_v11 = vmul.f32 %v2664_v10, %v1399_v5  ;;  %vm1407_vm0 = vweird.f32 %v2664_v10 }
 0x27b   :  { %vm1408_vm2 = vmor %vm1406_vm1, %vm1407_vm0 }
 0x27c   :  { %v1402_v28 = vmul.f32 %v2664_v10, %v1401_v11 }
 0x27e   :  { %v1403_v16 = vmul.f32 0.5, %v1402_v28 }
 0x280   :  { %v1404_v17 = vsub.f32 1.5, %v1403_v16 }
 0x282   :  { %v1405_v18 = vmul.f32 %v2664_v10, %v1404_v17 }
 0x284   :  { %v1409_v20 = vsel %vm1408_vm2, %v2664_v10, %v1405_v18 }
 0x285   :  { %v1410_v21 = vmul.f32 %v1409_v20, %v3099_v13  ;;  %v1411_v22 = vmul.f32 %v1409_v20, %v3101_v15 }
 0x286   :  { %v1415_v23 = vpop.xlane.xlu0 %1414 }
 0x287   :  { %v1416_v24 = vadd.f32 1e-12, %v1415_v23  ;;  %v1604_v25 = vpack.c.bf16 %v1410_v21, %v1410_v21  ;;  %v1605_v26 = vpack.c.bf16 %v1411_v22, %v1411_v22 }
 0x289   :  { %2665 = vrsqrt.f32 %v1416_v24  ;;  %1742 = vmatmul.bf16.vlgmr.msrb.gmra.mxu0 %v1604_v25  ;;  %1755 = vmatmul.bf16.vlgmr.msrb.gmra.mxu1 %v1605_v26  ;;  %vm1423_vm4 = vweird.f32 %v1416_v24 }
 0x28e   :  { %v1512_v27 = vpop.xlane.xlu0 %1511 }
 0x28f   :  { %v2666_v29 = vpop.eup %2665  ;;  %v1513_v30 = vadd.f32 1e-12, %v1512_v27 }
 0x290   :  { %v1418_v31 = vmul.f32 %v2666_v29, %v1416_v24  ;;  %vm1424_vm3 = vweird.f32 %v2666_v29 }
 0x291   :  { %2667 = vrsqrt.f32 %v1513_v30  ;;  %vm1425_vm5 = vmor %vm1423_vm4, %vm1424_vm3  ;;  %vm1520_vm7 = vweird.f32 %v1513_v30 }
 0x292   :  { %v1419_v32 = vmul.f32 %v2666_v29, %v1418_v31 }
 0x294   :  { %v1420_v33 = vmul.f32 0.5, %v1419_v32 }
 0x296   :  { %v1421_v34 = vsub.f32 1.5, %v1420_v33 }
 0x297   :  { %v2668_v35 = vpop.eup %2667 }
 0x298   :  { %v1422_v13 = vmul.f32 %v2666_v29, %v1421_v34  ;;  %v1515_v15 = vmul.f32 %v2668_v35, %v1513_v30  ;;  %vm1521_vm6 = vweird.f32 %v2668_v35 }
 0x299   :  { %vm1522_vm8 = vmor %vm1520_vm7, %vm1521_vm6 }
 0x29a   :  { %v1426_v36 = vsel %vm1425_vm5, %v2666_v29, %v1422_v13  ;;  %v1516_v37 = vmul.f32 %v2668_v35, %v1515_v15 }
 0x29b   :  { %v1427_v38 = vmul.f32 %v1426_v36, %v3110_v40  ;;  %v2662_v40 = vld [vmem:[%s3144_s13] ss:$0 sm:$0xff] }
 0x29c   :  { %v1517_v41 = vmul.f32 0.5, %v1516_v37 }
 0x29d   :  { %v1428_v42 = vpack.c.bf16 %v1427_v38, %v1427_v38 }
 0x29e   :  { %v1518_v43 = vsub.f32 1.5, %v1517_v41 }
 0x29f   :  { %1501 = vmatmul.bf16.vlgmr.msra.gmra.mxu2 %v1428_v42 }
 0x2a0   :  { %v1519_v44 = vmul.f32 %v2668_v35, %v1518_v43 }
 0x2a2   :  { %v1523_v45 = vsel %vm1522_vm8, %v2668_v35, %v1519_v44 }
 0x2a3   :  { %v1524_v47 = vmul.f32 %v1523_v45, %v3114_v46 }
 0x2a5   :  { %v1525_v48 = vpack.c.bf16 %v1524_v47, %v1524_v47 }
 0x2a7   :  { %1598 = vmatmul.bf16.vlgmr.msra.gmra.mxu3 %v1525_v48 }
 0x306   :  { %v1743_v49 = vpop.f32.mrf.mxu0  ;;  %v1756_v50 = vpop.f32.mrf.mxu1 }
 0x30e   :  { %v1745_v51 = vpop.f32.mrf.mxu0  ;;  %v1758_v52 = vpop.f32.mrf.mxu1 }
 0x322   :  { %v1502_v53 = vpop.f32.mrf.mxu2 }
 0x323   :  { %v1509_v39 = vadd.f32 %v2662_v40, %v1502_v53 }
 0x32a   :  { %v1504_v54 = vpop.f32.mrf.mxu2  ;;  %v1599_v55 = vpop.f32.mrf.mxu3 }
 0x32b   :  { %v1603_v56 = vadd.f32 %v1599_v55, %v1509_v39 }
 0x32d   :  { %v1744_v57 = vadd.f32 %v1743_v49, %v1603_v56  ;;  %1761 = vst [vmem:[%s3145_s14 + $0x8] sm:$0xff] %v1603_v56 }
 0x32f   :  { %v1757_v46 = vadd.f32 %v1756_v50, %v1744_v57 }
 0x331   :  { %1760 = vst [vmem:[%s3145_s14] sm:$0xff] %v1757_v46 }
 0x332   :  { %v1601_v59 = vpop.f32.mrf.mxu3 }
 0x333   :  { %1766 = vsyncpa [#allocation3], 1 }
 0x334   :  { %1767 = vsyncpa [#allocation5], 1 }
 0x335   :  { %1768 = vsyncpa [#allocation8], 1 }
 0x336   :  { %1769 = vsyncpa [#allocation11], 1 }

</bundles_post_ra>
